<compile_context>
chip_gen: v6e
topology: v6e:2x2x1
jax: 0.10.0
libtpu: 0.0.40
codegen_flags: <defaults>
</compile_context>

<pallas_src>
import functools

import jax
import jax.numpy as jnp
from jax import lax
from jax.experimental import pallas as pl
from jax.experimental.pallas import tpu as pltpu


def fused_rnn_kernel(x_ref, h0_ref, wih_ref, whh_ref, b_ref,
                     y_ref, hn_ref, work_scr,
                     *, seq_len, batch, num_layers, unroll):
    """Whole module in one invocation.

    x_ref   : (S*B, H)   flattened input sequence
    h0_ref  : (B, H)     initial hidden state
    wih_ref : (H, H)     input->hidden weight (pre-transposed: v @ W)
    whh_ref : (H, H)     hidden->hidden weight (pre-transposed: v @ W)
    b_ref   : (1, H)     combined bias (b_ih + b_hh)
    y_ref   : (S*B, H)   output sequence of the last layer
    hn_ref  : (NL, B, H) final hidden state of every layer (NL = N-1)
    work_scr: (S*B, H)   f32 scratch, shared between the hoisted projection xp
                         and the current layer's hidden sequence (in-place).
    """
    # bf16 MXU operands (f32 accumulation).  Weights are shared by all layers,
    # so cast once at the top of the kernel.
    w_ih = wih_ref[...].astype(jnp.bfloat16)
    w_hh = whh_ref[...].astype(jnp.bfloat16)
    bias = b_ref[...].astype(jnp.float32)            # (1, H), broadcasts over rows

    h = h0_ref[...].astype(jnp.float32)              # (B, H) running hidden state

    for layer in range(num_layers):                  # static, small (N-1)
        is_last = layer == num_layers - 1

        # Hoisted non-recurrent projection: one big MXU matmul for all S steps.
        # For layer > 0 the previous layer's hidden sequence sits in work_scr;
        # load it (value), then overwrite the slab with this layer's xp.
        cur = x_ref[...].astype(jnp.float32) if layer == 0 else work_scr[...]
        work_scr[...] = jnp.dot(cur.astype(jnp.bfloat16), w_ih,
                                preferred_element_type=jnp.float32) + bias

        def step(t, h_prev, *, is_last=is_last):
            row = pl.multiple_of(t * batch, batch)   # sublane-aligned offset
            pre = work_scr[pl.ds(row, batch), :] + jnp.dot(
                h_prev.astype(jnp.bfloat16), w_hh,
                preferred_element_type=jnp.float32)
            h_new = jnp.tanh(pre)                    # EUP, f32
            if is_last:
                # Last layer: write straight into the lane-dense output; the
                # old full-slab epilogue copy is eliminated.
                y_ref[pl.ds(row, batch), :] = h_new.astype(y_ref.dtype)
            else:
                # In-place overwrite of the xp row just consumed (WAR safe:
                # strictly sequential and the store depends on the load).
                work_scr[pl.ds(row, batch), :] = h_new
            return h_new

        # Sequential recurrence over time; bounded unroll for LLO visibility
        # without code-size blowup at realistic S.
        h = lax.fori_loop(0, seq_len, step, h, unroll=unroll)

        hn_ref[layer] = h.astype(hn_ref.dtype)       # written exactly once


@functools.partial(jax.jit, static_argnames=("N",))
def layer_forward(x, h0, w_ih, w_hh, b, N):
    """Pallas equivalent of Layer.forward: apply the (shared-weight) cell
    N-1 times; returns (x_out, hn) with hn = concat of per-layer final h."""
    S, B, H = x.shape
    NL = N - 1
    x2 = x.reshape(S * B, H)                         # lane-dense (H=128) slab
    unroll = min(S, 8)

    kernel = functools.partial(
        fused_rnn_kernel, seq_len=S, batch=B, num_layers=NL, unroll=unroll)

    grid_spec = pltpu.PrefetchScalarGridSpec(
        num_scalar_prefetch=0,
        grid=(1,),                                   # single invocation; all work in-kernel
        in_specs=[
            pl.BlockSpec((S * B, H), lambda i: (0, 0)),   # x (flattened)
            pl.BlockSpec((B, H), lambda i: (0, 0)),       # h0
            pl.BlockSpec((H, H), lambda i: (0, 0)),       # W_ih
            pl.BlockSpec((H, H), lambda i: (0, 0)),       # W_hh
            pl.BlockSpec((1, H), lambda i: (0, 0)),       # bias
        ],
        out_specs=[
            pl.BlockSpec((S * B, H), lambda i: (0, 0)),     # y (flattened)
            pl.BlockSpec((NL, B, H), lambda i: (0, 0, 0)),  # hn
        ],
        scratch_shapes=[
            pltpu.VMEM((S * B, H), jnp.float32),     # shared xp / hidden-seq slab
        ],
    )

    y2, hn = pl.pallas_call(
        kernel,
        out_shape=(
            jax.ShapeDtypeStruct((S * B, H), x.dtype),
            jax.ShapeDtypeStruct((NL, B, H), x.dtype),
        ),
        grid_spec=grid_spec,
        compiler_params=pltpu.CompilerParams(
            dimension_semantics=("arbitrary",)),
    )(x2, h0[0], w_ih, w_hh, b)

    return y2.reshape(S, B, H), hn


def reference_forward(x, h0, w_ih, w_hh, b, N, matmul_dtype=jnp.float32):
    """Pure-JAX reference (lax.scan).  matmul_dtype=bfloat16 reproduces the
    kernel's MXU-operand precision (f32 accumulation either way)."""
    wi = w_ih.astype(matmul_dtype)
    wh = w_hh.astype(matmul_dtype)

    def one_layer(xs, h):
        def step(h_prev, x_t):
            z = (jnp.dot(x_t.astype(matmul_dtype), wi,
                         preferred_element_type=jnp.float32)
                 + jnp.dot(h_prev.astype(matmul_dtype), wh,
                           preferred_element_type=jnp.float32)
                 + b)
            h_new = jnp.tanh(z)
            return h_new, h_new
        h_last, ys = lax.scan(step, h, xs)
        return ys, h_last

    h = h0[0]
    hs = []
    for _ in range(N - 1):
        x, h = one_layer(x, h)
        hs.append(h[None])
    return x, jnp.concatenate(hs, axis=0)


if __name__ == "__main__":
    # Small, deterministic problem: seq=8, batch=8, hidden=128, N=3 (=> 2 layers).
    S, B, H, N = 8, 8, 128, 3

    key = jax.random.PRNGKey(0)
    kx, kh, kwi, kwh, kb1, kb2 = jax.random.split(key, 6)

    scale = 1.0 / jnp.sqrt(H)                        # nn.RNN default init range
    x = jax.random.normal(kx, (S, B, H), dtype=jnp.float32)
    h0 = jax.random.normal(kh, (1, B, H), dtype=jnp.float32)
    # Stored as (H, H) already transposed so the kernel computes v @ W.
    w_ih = jax.random.uniform(kwi, (H, H), jnp.float32, -scale, scale)
    w_hh = jax.random.uniform(kwh, (H, H), jnp.float32, -scale, scale)
    b_ih = jax.random.uniform(kb1, (1, H), jnp.float32, -scale, scale)
    b_hh = jax.random.uniform(kb2, (1, H), jnp.float32, -scale, scale)
    b = b_ih + b_hh

    y, hn = layer_forward(x, h0, w_ih, w_hh, b, N=N)
    jax.block_until_ready((y, hn))

    assert y.shape == (S, B, H) and hn.shape == (N - 1, B, H)

    # Tight structural check against a matching bf16-operand reference.
    y_bf, hn_bf = reference_forward(x, h0, w_ih, w_hh, b[0], N,
                                    matmul_dtype=jnp.bfloat16)
    assert jnp.allclose(y, y_bf, atol=5e-3, rtol=5e-3), \
        float(jnp.max(jnp.abs(y - y_bf)))
    assert jnp.allclose(hn, hn_bf, atol=5e-3, rtol=5e-3), \
        float(jnp.max(jnp.abs(hn - hn_bf)))

    # Looser check against the full-f32 reference (bf16 MXU operands ~1e-2).
    y_f32, hn_f32 = reference_forward(x, h0, w_ih, w_hh, b[0], N,
                                      matmul_dtype=jnp.float32)
    assert jnp.allclose(y, y_f32, atol=4e-2, rtol=4e-2), \
        float(jnp.max(jnp.abs(y - y_f32)))
    assert jnp.allclose(hn, hn_f32, atol=4e-2, rtol=4e-2), \
        float(jnp.max(jnp.abs(hn - hn_f32)))

    print("KERNEL_OK")
</pallas_src>

<mosaic_0001>
module attributes {stable_mosaic.version = 11 : i64} {
  func.func @fused_rnn_kernel(%arg0: i32, %arg1: memref<64x128xf32, #tpu.memory_space<vmem>>, %arg2: memref<8x128xf32, #tpu.memory_space<vmem>>, %arg3: memref<128x128xf32, #tpu.memory_space<vmem>>, %arg4: memref<128x128xf32, #tpu.memory_space<vmem>>, %arg5: memref<1x128xf32, #tpu.memory_space<vmem>>, %arg6: memref<64x128xf32, #tpu.memory_space<vmem>>, %arg7: memref<2x8x128xf32, #tpu.memory_space<vmem>>, %arg8: memref<64x128xf32, #tpu.memory_space<vmem>>) attributes {dimension_semantics = [#tpu.dimension_semantics<arbitrary>], iteration_bounds = array<i64: 1>, scalar_prefetch = 0 : i64, scratch_operands = 1 : i64, tpu.core_type = #tpu.core_type<tc>, window_params = [{pipeline_mode = #tpu.pipeline_mode<synchronous>, transform_indices = @transform_0, window_bounds = array<i64: 64, 128>}, {pipeline_mode = #tpu.pipeline_mode<synchronous>, transform_indices = @transform_1, window_bounds = array<i64: 8, 128>}, {pipeline_mode = #tpu.pipeline_mode<synchronous>, transform_indices = @transform_2, window_bounds = array<i64: 128, 128>}, {pipeline_mode = #tpu.pipeline_mode<synchronous>, transform_indices = @transform_3, window_bounds = array<i64: 128, 128>}, {pipeline_mode = #tpu.pipeline_mode<synchronous>, transform_indices = @transform_4, window_bounds = array<i64: 1, 128>}, {pipeline_mode = #tpu.pipeline_mode<synchronous>, transform_indices = @transform_5, window_bounds = array<i64: 64, 128>}, {pipeline_mode = #tpu.pipeline_mode<synchronous>, transform_indices = @transform_6, window_bounds = array<i64: 2, 8, 128>}]} {
    %c0 = arith.constant 0 : index
    %c0_0 = arith.constant 0 : index
    %0 = vector.load %arg3[%c0, %c0_0] : memref<128x128xf32, #tpu.memory_space<vmem>>, vector<128x128xf32>
    %1 = arith.truncf %0 : vector<128x128xf32> to vector<128x128xbf16>
    %c0_1 = arith.constant 0 : index
    %c0_2 = arith.constant 0 : index
    %2 = vector.load %arg4[%c0_1, %c0_2] : memref<128x128xf32, #tpu.memory_space<vmem>>, vector<128x128xf32>
    %3 = arith.truncf %2 : vector<128x128xf32> to vector<128x128xbf16>
    %c0_3 = arith.constant 0 : index
    %c0_4 = arith.constant 0 : index
    %4 = vector.load %arg5[%c0_3, %c0_4] : memref<1x128xf32, #tpu.memory_space<vmem>>, vector<1x128xf32>
    %c0_5 = arith.constant 0 : index
    %c0_6 = arith.constant 0 : index
    %5 = vector.load %arg2[%c0_5, %c0_6] : memref<8x128xf32, #tpu.memory_space<vmem>>, vector<8x128xf32>
    %c0_7 = arith.constant 0 : index
    %c0_8 = arith.constant 0 : index
    %6 = vector.load %arg1[%c0_7, %c0_8] : memref<64x128xf32, #tpu.memory_space<vmem>>, vector<64x128xf32>
    %7 = arith.truncf %6 : vector<64x128xf32> to vector<64x128xbf16>
    %cst = arith.constant dense<0.000000e+00> : vector<64x128xf32>
    %8 = tpu.matmul %7, %1, %cst {dimension_numbers = #tpu.dot_dimension_numbers<[1], [0], [0], [1], [0, 0, 1, 1], [], []>} : vector<64x128xbf16>, vector<128x128xbf16>, vector<64x128xf32> -> vector<64x128xf32>
    %9 = vector.broadcast %4 : vector<1x128xf32> to vector<64x128xf32>
    %10 = arith.addf %8, %9 : vector<64x128xf32>
    %c0_9 = arith.constant 0 : index
    %c0_10 = arith.constant 0 : index
    %11 = vector.load %arg8[%c0_9, %c0_10] : memref<64x128xf32, #tpu.memory_space<vmem>>, vector<64x128xf32>
    tpu.vector_store %arg8[%c0_9, %c0_10], %10 {strides = array<i32>} : memref<64x128xf32, #tpu.memory_space<vmem>>, vector<64x128xf32>,
    %c0_i32 = arith.constant 0 : i32
    %c8_i32 = arith.constant 8 : i32
    %12 = arith.muli %c0_i32, %c8_i32 : i32
    %13 = tpu.assume_multiple %12, 8 : i32
    %14 = arith.index_cast %13 : i32 to index
    %c0_11 = arith.constant 0 : index
    %15 = vector.load %arg8[%14, %c0_11] : memref<64x128xf32, #tpu.memory_space<vmem>>, vector<8x128xf32>
    %16 = arith.truncf %5 : vector<8x128xf32> to vector<8x128xbf16>
    %cst_12 = arith.constant dense<0.000000e+00> : vector<8x128xf32>
    %17 = tpu.matmul %16, %3, %cst_12 {dimension_numbers = #tpu.dot_dimension_numbers<[1], [0], [0], [1], [0, 0, 1, 1], [], []>} : vector<8x128xbf16>, vector<128x128xbf16>, vector<8x128xf32> -> vector<8x128xf32>
    %18 = arith.addf %15, %17 : vector<8x128xf32>
    %19 = math.tanh %18 : vector<8x128xf32>
    %20 = arith.index_cast %13 : i32 to index
    %c0_13 = arith.constant 0 : index
    %21 = vector.load %arg8[%20, %c0_13] : memref<64x128xf32, #tpu.memory_space<vmem>>, vector<8x128xf32>
    tpu.vector_store %arg8[%20, %c0_13], %19 {strides = array<i32>} : memref<64x128xf32, #tpu.memory_space<vmem>>, vector<8x128xf32>,
    %c1_i32 = arith.constant 1 : i32
    %c8_i32_14 = arith.constant 8 : i32
    %22 = arith.muli %c1_i32, %c8_i32_14 : i32
    %23 = tpu.assume_multiple %22, 8 : i32
    %24 = arith.index_cast %23 : i32 to index
    %c0_15 = arith.constant 0 : index
    %25 = vector.load %arg8[%24, %c0_15] : memref<64x128xf32, #tpu.memory_space<vmem>>, vector<8x128xf32>
    %26 = arith.truncf %19 : vector<8x128xf32> to vector<8x128xbf16>
    %cst_16 = arith.constant dense<0.000000e+00> : vector<8x128xf32>
    %27 = tpu.matmul %26, %3, %cst_16 {dimension_numbers = #tpu.dot_dimension_numbers<[1], [0], [0], [1], [0, 0, 1, 1], [], []>} : vector<8x128xbf16>, vector<128x128xbf16>, vector<8x128xf32> -> vector<8x128xf32>
    %28 = arith.addf %25, %27 : vector<8x128xf32>
    %29 = math.tanh %28 : vector<8x128xf32>
    %30 = arith.index_cast %23 : i32 to index
    %c0_17 = arith.constant 0 : index
    %31 = vector.load %arg8[%30, %c0_17] : memref<64x128xf32, #tpu.memory_space<vmem>>, vector<8x128xf32>
    tpu.vector_store %arg8[%30, %c0_17], %29 {strides = array<i32>} : memref<64x128xf32, #tpu.memory_space<vmem>>, vector<8x128xf32>,
    %c2_i32 = arith.constant 2 : i32
    %c8_i32_18 = arith.constant 8 : i32
    %32 = arith.muli %c2_i32, %c8_i32_18 : i32
    %33 = tpu.assume_multiple %32, 8 : i32
    %34 = arith.index_cast %33 : i32 to index
    %c0_19 = arith.constant 0 : index
    %35 = vector.load %arg8[%34, %c0_19] : memref<64x128xf32, #tpu.memory_space<vmem>>, vector<8x128xf32>
    %36 = arith.truncf %29 : vector<8x128xf32> to vector<8x128xbf16>
    %cst_20 = arith.constant dense<0.000000e+00> : vector<8x128xf32>
    %37 = tpu.matmul %36, %3, %cst_20 {dimension_numbers = #tpu.dot_dimension_numbers<[1], [0], [0], [1], [0, 0, 1, 1], [], []>} : vector<8x128xbf16>, vector<128x128xbf16>, vector<8x128xf32> -> vector<8x128xf32>
    %38 = arith.addf %35, %37 : vector<8x128xf32>
    %39 = math.tanh %38 : vector<8x128xf32>
    %40 = arith.index_cast %33 : i32 to index
    %c0_21 = arith.constant 0 : index
    %41 = vector.load %arg8[%40, %c0_21] : memref<64x128xf32, #tpu.memory_space<vmem>>, vector<8x128xf32>
    tpu.vector_store %arg8[%40, %c0_21], %39 {strides = array<i32>} : memref<64x128xf32, #tpu.memory_space<vmem>>, vector<8x128xf32>,
    %c3_i32 = arith.constant 3 : i32
    %c8_i32_22 = arith.constant 8 : i32
    %42 = arith.muli %c3_i32, %c8_i32_22 : i32
    %43 = tpu.assume_multiple %42, 8 : i32
    %44 = arith.index_cast %43 : i32 to index
    %c0_23 = arith.constant 0 : index
    %45 = vector.load %arg8[%44, %c0_23] : memref<64x128xf32, #tpu.memory_space<vmem>>, vector<8x128xf32>
    %46 = arith.truncf %39 : vector<8x128xf32> to vector<8x128xbf16>
    %cst_24 = arith.constant dense<0.000000e+00> : vector<8x128xf32>
    %47 = tpu.matmul %46, %3, %cst_24 {dimension_numbers = #tpu.dot_dimension_numbers<[1], [0], [0], [1], [0, 0, 1, 1], [], []>} : vector<8x128xbf16>, vector<128x128xbf16>, vector<8x128xf32> -> vector<8x128xf32>
    %48 = arith.addf %45, %47 : vector<8x128xf32>
    %49 = math.tanh %48 : vector<8x128xf32>
    %50 = arith.index_cast %43 : i32 to index
    %c0_25 = arith.constant 0 : index
    %51 = vector.load %arg8[%50, %c0_25] : memref<64x128xf32, #tpu.memory_space<vmem>>, vector<8x128xf32>
    tpu.vector_store %arg8[%50, %c0_25], %49 {strides = array<i32>} : memref<64x128xf32, #tpu.memory_space<vmem>>, vector<8x128xf32>,
    %c4_i32 = arith.constant 4 : i32
    %c8_i32_26 = arith.constant 8 : i32
    %52 = arith.muli %c4_i32, %c8_i32_26 : i32
    %53 = tpu.assume_multiple %52, 8 : i32
    %54 = arith.index_cast %53 : i32 to index
    %c0_27 = arith.constant 0 : index
    %55 = vector.load %arg8[%54, %c0_27] : memref<64x128xf32, #tpu.memory_space<vmem>>, vector<8x128xf32>
    %56 = arith.truncf %49 : vector<8x128xf32> to vector<8x128xbf16>
    %cst_28 = arith.constant dense<0.000000e+00> : vector<8x128xf32>
    %57 = tpu.matmul %56, %3, %cst_28 {dimension_numbers = #tpu.dot_dimension_numbers<[1], [0], [0], [1], [0, 0, 1, 1], [], []>} : vector<8x128xbf16>, vector<128x128xbf16>, vector<8x128xf32> -> vector<8x128xf32>
    %58 = arith.addf %55, %57 : vector<8x128xf32>
    %59 = math.tanh %58 : vector<8x128xf32>
    %60 = arith.index_cast %53 : i32 to index
    %c0_29 = arith.constant 0 : index
    %61 = vector.load %arg8[%60, %c0_29] : memref<64x128xf32, #tpu.memory_space<vmem>>, vector<8x128xf32>
    tpu.vector_store %arg8[%60, %c0_29], %59 {strides = array<i32>} : memref<64x128xf32, #tpu.memory_space<vmem>>, vector<8x128xf32>,
    %c5_i32 = arith.constant 5 : i32
    %c8_i32_30 = arith.constant 8 : i32
    %62 = arith.muli %c5_i32, %c8_i32_30 : i32
    %63 = tpu.assume_multiple %62, 8 : i32
    %64 = arith.index_cast %63 : i32 to index
    %c0_31 = arith.constant 0 : index
    %65 = vector.load %arg8[%64, %c0_31] : memref<64x128xf32, #tpu.memory_space<vmem>>, vector<8x128xf32>
    %66 = arith.truncf %59 : vector<8x128xf32> to vector<8x128xbf16>
    %cst_32 = arith.constant dense<0.000000e+00> : vector<8x128xf32>
    %67 = tpu.matmul %66, %3, %cst_32 {dimension_numbers = #tpu.dot_dimension_numbers<[1], [0], [0], [1], [0, 0, 1, 1], [], []>} : vector<8x128xbf16>, vector<128x128xbf16>, vector<8x128xf32> -> vector<8x128xf32>
    %68 = arith.addf %65, %67 : vector<8x128xf32>
    %69 = math.tanh %68 : vector<8x128xf32>
    %70 = arith.index_cast %63 : i32 to index
    %c0_33 = arith.constant 0 : index
    %71 = vector.load %arg8[%70, %c0_33] : memref<64x128xf32, #tpu.memory_space<vmem>>, vector<8x128xf32>
    tpu.vector_store %arg8[%70, %c0_33], %69 {strides = array<i32>} : memref<64x128xf32, #tpu.memory_space<vmem>>, vector<8x128xf32>,
    %c6_i32 = arith.constant 6 : i32
    %c8_i32_34 = arith.constant 8 : i32
    %72 = arith.muli %c6_i32, %c8_i32_34 : i32
    %73 = tpu.assume_multiple %72, 8 : i32
    %74 = arith.index_cast %73 : i32 to index
    %c0_35 = arith.constant 0 : index
    %75 = vector.load %arg8[%74, %c0_35] : memref<64x128xf32, #tpu.memory_space<vmem>>, vector<8x128xf32>
    %76 = arith.truncf %69 : vector<8x128xf32> to vector<8x128xbf16>
    %cst_36 = arith.constant dense<0.000000e+00> : vector<8x128xf32>
    %77 = tpu.matmul %76, %3, %cst_36 {dimension_numbers = #tpu.dot_dimension_numbers<[1], [0], [0], [1], [0, 0, 1, 1], [], []>} : vector<8x128xbf16>, vector<128x128xbf16>, vector<8x128xf32> -> vector<8x128xf32>
    %78 = arith.addf %75, %77 : vector<8x128xf32>
    %79 = math.tanh %78 : vector<8x128xf32>
    %80 = arith.index_cast %73 : i32 to index
    %c0_37 = arith.constant 0 : index
    %81 = vector.load %arg8[%80, %c0_37] : memref<64x128xf32, #tpu.memory_space<vmem>>, vector<8x128xf32>
    tpu.vector_store %arg8[%80, %c0_37], %79 {strides = array<i32>} : memref<64x128xf32, #tpu.memory_space<vmem>>, vector<8x128xf32>,
    %c7_i32 = arith.constant 7 : i32
    %c8_i32_38 = arith.constant 8 : i32
    %82 = arith.muli %c7_i32, %c8_i32_38 : i32
    %83 = tpu.assume_multiple %82, 8 : i32
    %84 = arith.index_cast %83 : i32 to index
    %c0_39 = arith.constant 0 : index
    %85 = vector.load %arg8[%84, %c0_39] : memref<64x128xf32, #tpu.memory_space<vmem>>, vector<8x128xf32>
    %86 = arith.truncf %79 : vector<8x128xf32> to vector<8x128xbf16>
    %cst_40 = arith.constant dense<0.000000e+00> : vector<8x128xf32>
    %87 = tpu.matmul %86, %3, %cst_40 {dimension_numbers = #tpu.dot_dimension_numbers<[1], [0], [0], [1], [0, 0, 1, 1], [], []>} : vector<8x128xbf16>, vector<128x128xbf16>, vector<8x128xf32> -> vector<8x128xf32>
    %88 = arith.addf %85, %87 : vector<8x128xf32>
    %89 = math.tanh %88 : vector<8x128xf32>
    %90 = arith.index_cast %83 : i32 to index
    %c0_41 = arith.constant 0 : index
    %91 = vector.load %arg8[%90, %c0_41] : memref<64x128xf32, #tpu.memory_space<vmem>>, vector<8x128xf32>
    tpu.vector_store %arg8[%90, %c0_41], %89 {strides = array<i32>} : memref<64x128xf32, #tpu.memory_space<vmem>>, vector<8x128xf32>,
    %c8_i32_42 = arith.constant 8 : i32
    %c0_43 = arith.constant 0 : index
    %c0_44 = arith.constant 0 : index
    %c0_45 = arith.constant 0 : index
    %92 = vector.load %arg7[%c0_43, %c0_44, %c0_45] : memref<2x8x128xf32, #tpu.memory_space<vmem>>, vector<1x8x128xf32>
    %93 = vector.shape_cast %92 : vector<1x8x128xf32> to vector<8x128xf32>
    %94 = vector.shape_cast %89 : vector<8x128xf32> to vector<1x8x128xf32>
    tpu.vector_store %arg7[%c0_43, %c0_44, %c0_45], %94 {strides = array<i32>} : memref<2x8x128xf32, #tpu.memory_space<vmem>>, vector<1x8x128xf32>,
    %c0_46 = arith.constant 0 : index
    %c0_47 = arith.constant 0 : index
    %95 = vector.load %arg8[%c0_46, %c0_47] : memref<64x128xf32, #tpu.memory_space<vmem>>, vector<64x128xf32>
    %96 = arith.truncf %95 : vector<64x128xf32> to vector<64x128xbf16>
    %cst_48 = arith.constant dense<0.000000e+00> : vector<64x128xf32>
    %97 = tpu.matmul %96, %1, %cst_48 {dimension_numbers = #tpu.dot_dimension_numbers<[1], [0], [0], [1], [0, 0, 1, 1], [], []>} : vector<64x128xbf16>, vector<128x128xbf16>, vector<64x128xf32> -> vector<64x128xf32>
    %98 = vector.broadcast %4 : vector<1x128xf32> to vector<64x128xf32>
    %99 = arith.addf %97, %98 : vector<64x128xf32>
    %c0_49 = arith.constant 0 : index
    %c0_50 = arith.constant 0 : index
    %100 = vector.load %arg8[%c0_49, %c0_50] : memref<64x128xf32, #tpu.memory_space<vmem>>, vector<64x128xf32>
    tpu.vector_store %arg8[%c0_49, %c0_50], %99 {strides = array<i32>} : memref<64x128xf32, #tpu.memory_space<vmem>>, vector<64x128xf32>,
    %c0_i32_51 = arith.constant 0 : i32
    %c8_i32_52 = arith.constant 8 : i32
    %101 = arith.muli %c0_i32_51, %c8_i32_52 : i32
    %102 = tpu.assume_multiple %101, 8 : i32
    %103 = arith.index_cast %102 : i32 to index
    %c0_53 = arith.constant 0 : index
    %104 = vector.load %arg8[%103, %c0_53] : memref<64x128xf32, #tpu.memory_space<vmem>>, vector<8x128xf32>
    %105 = arith.truncf %89 : vector<8x128xf32> to vector<8x128xbf16>
    %cst_54 = arith.constant dense<0.000000e+00> : vector<8x128xf32>
    %106 = tpu.matmul %105, %3, %cst_54 {dimension_numbers = #tpu.dot_dimension_numbers<[1], [0], [0], [1], [0, 0, 1, 1], [], []>} : vector<8x128xbf16>, vector<128x128xbf16>, vector<8x128xf32> -> vector<8x128xf32>
    %107 = arith.addf %104, %106 : vector<8x128xf32>
    %108 = math.tanh %107 : vector<8x128xf32>
    %109 = arith.index_cast %102 : i32 to index
    %c0_55 = arith.constant 0 : index
    %110 = vector.load %arg6[%109, %c0_55] : memref<64x128xf32, #tpu.memory_space<vmem>>, vector<8x128xf32>
    tpu.vector_store %arg6[%109, %c0_55], %108 {strides = array<i32>} : memref<64x128xf32, #tpu.memory_space<vmem>>, vector<8x128xf32>,
    %c1_i32_56 = arith.constant 1 : i32
    %c8_i32_57 = arith.constant 8 : i32
    %111 = arith.muli %c1_i32_56, %c8_i32_57 : i32
    %112 = tpu.assume_multiple %111, 8 : i32
    %113 = arith.index_cast %112 : i32 to index
    %c0_58 = arith.constant 0 : index
    %114 = vector.load %arg8[%113, %c0_58] : memref<64x128xf32, #tpu.memory_space<vmem>>, vector<8x128xf32>
    %115 = arith.truncf %108 : vector<8x128xf32> to vector<8x128xbf16>
    %cst_59 = arith.constant dense<0.000000e+00> : vector<8x128xf32>
    %116 = tpu.matmul %115, %3, %cst_59 {dimension_numbers = #tpu.dot_dimension_numbers<[1], [0], [0], [1], [0, 0, 1, 1], [], []>} : vector<8x128xbf16>, vector<128x128xbf16>, vector<8x128xf32> -> vector<8x128xf32>
    %117 = arith.addf %114, %116 : vector<8x128xf32>
    %118 = math.tanh %117 : vector<8x128xf32>
    %119 = arith.index_cast %112 : i32 to index
    %c0_60 = arith.constant 0 : index
    %120 = vector.load %arg6[%119, %c0_60] : memref<64x128xf32, #tpu.memory_space<vmem>>, vector<8x128xf32>
    tpu.vector_store %arg6[%119, %c0_60], %118 {strides = array<i32>} : memref<64x128xf32, #tpu.memory_space<vmem>>, vector<8x128xf32>,
    %c2_i32_61 = arith.constant 2 : i32
    %c8_i32_62 = arith.constant 8 : i32
    %121 = arith.muli %c2_i32_61, %c8_i32_62 : i32
    %122 = tpu.assume_multiple %121, 8 : i32
    %123 = arith.index_cast %122 : i32 to index
    %c0_63 = arith.constant 0 : index
    %124 = vector.load %arg8[%123, %c0_63] : memref<64x128xf32, #tpu.memory_space<vmem>>, vector<8x128xf32>
    %125 = arith.truncf %118 : vector<8x128xf32> to vector<8x128xbf16>
    %cst_64 = arith.constant dense<0.000000e+00> : vector<8x128xf32>
    %126 = tpu.matmul %125, %3, %cst_64 {dimension_numbers = #tpu.dot_dimension_numbers<[1], [0], [0], [1], [0, 0, 1, 1], [], []>} : vector<8x128xbf16>, vector<128x128xbf16>, vector<8x128xf32> -> vector<8x128xf32>
    %127 = arith.addf %124, %126 : vector<8x128xf32>
    %128 = math.tanh %127 : vector<8x128xf32>
    %129 = arith.index_cast %122 : i32 to index
    %c0_65 = arith.constant 0 : index
    %130 = vector.load %arg6[%129, %c0_65] : memref<64x128xf32, #tpu.memory_space<vmem>>, vector<8x128xf32>
    tpu.vector_store %arg6[%129, %c0_65], %128 {strides = array<i32>} : memref<64x128xf32, #tpu.memory_space<vmem>>, vector<8x128xf32>,
    %c3_i32_66 = arith.constant 3 : i32
    %c8_i32_67 = arith.constant 8 : i32
    %131 = arith.muli %c3_i32_66, %c8_i32_67 : i32
    %132 = tpu.assume_multiple %131, 8 : i32
    %133 = arith.index_cast %132 : i32 to index
    %c0_68 = arith.constant 0 : index
    %134 = vector.load %arg8[%133, %c0_68] : memref<64x128xf32, #tpu.memory_space<vmem>>, vector<8x128xf32>
    %135 = arith.truncf %128 : vector<8x128xf32> to vector<8x128xbf16>
    %cst_69 = arith.constant dense<0.000000e+00> : vector<8x128xf32>
    %136 = tpu.matmul %135, %3, %cst_69 {dimension_numbers = #tpu.dot_dimension_numbers<[1], [0], [0], [1], [0, 0, 1, 1], [], []>} : vector<8x128xbf16>, vector<128x128xbf16>, vector<8x128xf32> -> vector<8x128xf32>
    %137 = arith.addf %134, %136 : vector<8x128xf32>
    %138 = math.tanh %137 : vector<8x128xf32>
    %139 = arith.index_cast %132 : i32 to index
    %c0_70 = arith.constant 0 : index
    %140 = vector.load %arg6[%139, %c0_70] : memref<64x128xf32, #tpu.memory_space<vmem>>, vector<8x128xf32>
    tpu.vector_store %arg6[%139, %c0_70], %138 {strides = array<i32>} : memref<64x128xf32, #tpu.memory_space<vmem>>, vector<8x128xf32>,
    %c4_i32_71 = arith.constant 4 : i32
    %c8_i32_72 = arith.constant 8 : i32
    %141 = arith.muli %c4_i32_71, %c8_i32_72 : i32
    %142 = tpu.assume_multiple %141, 8 : i32
    %143 = arith.index_cast %142 : i32 to index
    %c0_73 = arith.constant 0 : index
    %144 = vector.load %arg8[%143, %c0_73] : memref<64x128xf32, #tpu.memory_space<vmem>>, vector<8x128xf32>
    %145 = arith.truncf %138 : vector<8x128xf32> to vector<8x128xbf16>
    %cst_74 = arith.constant dense<0.000000e+00> : vector<8x128xf32>
    %146 = tpu.matmul %145, %3, %cst_74 {dimension_numbers = #tpu.dot_dimension_numbers<[1], [0], [0], [1], [0, 0, 1, 1], [], []>} : vector<8x128xbf16>, vector<128x128xbf16>, vector<8x128xf32> -> vector<8x128xf32>
    %147 = arith.addf %144, %146 : vector<8x128xf32>
    %148 = math.tanh %147 : vector<8x128xf32>
    %149 = arith.index_cast %142 : i32 to index
    %c0_75 = arith.constant 0 : index
    %150 = vector.load %arg6[%149, %c0_75] : memref<64x128xf32, #tpu.memory_space<vmem>>, vector<8x128xf32>
    tpu.vector_store %arg6[%149, %c0_75], %148 {strides = array<i32>} : memref<64x128xf32, #tpu.memory_space<vmem>>, vector<8x128xf32>,
    %c5_i32_76 = arith.constant 5 : i32
    %c8_i32_77 = arith.constant 8 : i32
    %151 = arith.muli %c5_i32_76, %c8_i32_77 : i32
    %152 = tpu.assume_multiple %151, 8 : i32
    %153 = arith.index_cast %152 : i32 to index
    %c0_78 = arith.constant 0 : index
    %154 = vector.load %arg8[%153, %c0_78] : memref<64x128xf32, #tpu.memory_space<vmem>>, vector<8x128xf32>
    %155 = arith.truncf %148 : vector<8x128xf32> to vector<8x128xbf16>
    %cst_79 = arith.constant dense<0.000000e+00> : vector<8x128xf32>
    %156 = tpu.matmul %155, %3, %cst_79 {dimension_numbers = #tpu.dot_dimension_numbers<[1], [0], [0], [1], [0, 0, 1, 1], [], []>} : vector<8x128xbf16>, vector<128x128xbf16>, vector<8x128xf32> -> vector<8x128xf32>
    %157 = arith.addf %154, %156 : vector<8x128xf32>
    %158 = math.tanh %157 : vector<8x128xf32>
    %159 = arith.index_cast %152 : i32 to index
    %c0_80 = arith.constant 0 : index
    %160 = vector.load %arg6[%159, %c0_80] : memref<64x128xf32, #tpu.memory_space<vmem>>, vector<8x128xf32>
    tpu.vector_store %arg6[%159, %c0_80], %158 {strides = array<i32>} : memref<64x128xf32, #tpu.memory_space<vmem>>, vector<8x128xf32>,
    %c6_i32_81 = arith.constant 6 : i32
    %c8_i32_82 = arith.constant 8 : i32
    %161 = arith.muli %c6_i32_81, %c8_i32_82 : i32
    %162 = tpu.assume_multiple %161, 8 : i32
    %163 = arith.index_cast %162 : i32 to index
    %c0_83 = arith.constant 0 : index
    %164 = vector.load %arg8[%163, %c0_83] : memref<64x128xf32, #tpu.memory_space<vmem>>, vector<8x128xf32>
    %165 = arith.truncf %158 : vector<8x128xf32> to vector<8x128xbf16>
    %cst_84 = arith.constant dense<0.000000e+00> : vector<8x128xf32>
    %166 = tpu.matmul %165, %3, %cst_84 {dimension_numbers = #tpu.dot_dimension_numbers<[1], [0], [0], [1], [0, 0, 1, 1], [], []>} : vector<8x128xbf16>, vector<128x128xbf16>, vector<8x128xf32> -> vector<8x128xf32>
    %167 = arith.addf %164, %166 : vector<8x128xf32>
    %168 = math.tanh %167 : vector<8x128xf32>
    %169 = arith.index_cast %162 : i32 to index
    %c0_85 = arith.constant 0 : index
    %170 = vector.load %arg6[%169, %c0_85] : memref<64x128xf32, #tpu.memory_space<vmem>>, vector<8x128xf32>
    tpu.vector_store %arg6[%169, %c0_85], %168 {strides = array<i32>} : memref<64x128xf32, #tpu.memory_space<vmem>>, vector<8x128xf32>,
    %c7_i32_86 = arith.constant 7 : i32
    %c8_i32_87 = arith.constant 8 : i32
    %171 = arith.muli %c7_i32_86, %c8_i32_87 : i32
    %172 = tpu.assume_multiple %171, 8 : i32
    %173 = arith.index_cast %172 : i32 to index
    %c0_88 = arith.constant 0 : index
    %174 = vector.load %arg8[%173, %c0_88] : memref<64x128xf32, #tpu.memory_space<vmem>>, vector<8x128xf32>
    %175 = arith.truncf %168 : vector<8x128xf32> to vector<8x128xbf16>
    %cst_89 = arith.constant dense<0.000000e+00> : vector<8x128xf32>
    %176 = tpu.matmul %175, %3, %cst_89 {dimension_numbers = #tpu.dot_dimension_numbers<[1], [0], [0], [1], [0, 0, 1, 1], [], []>} : vector<8x128xbf16>, vector<128x128xbf16>, vector<8x128xf32> -> vector<8x128xf32>
    %177 = arith.addf %174, %176 : vector<8x128xf32>
    %178 = math.tanh %177 : vector<8x128xf32>
    %179 = arith.index_cast %172 : i32 to index
    %c0_90 = arith.constant 0 : index
    %180 = vector.load %arg6[%179, %c0_90] : memref<64x128xf32, #tpu.memory_space<vmem>>, vector<8x128xf32>
    tpu.vector_store %arg6[%179, %c0_90], %178 {strides = array<i32>} : memref<64x128xf32, #tpu.memory_space<vmem>>, vector<8x128xf32>,
    %c8_i32_91 = arith.constant 8 : i32
    %c1 = arith.constant 1 : index
    %c0_92 = arith.constant 0 : index
    %c0_93 = arith.constant 0 : index
    %181 = vector.load %arg7[%c1, %c0_92, %c0_93] : memref<2x8x128xf32, #tpu.memory_space<vmem>>, vector<1x8x128xf32>
    %182 = vector.shape_cast %181 : vector<1x8x128xf32> to vector<8x128xf32>
    %183 = vector.shape_cast %178 : vector<8x128xf32> to vector<1x8x128xf32>
    tpu.vector_store %arg7[%c1, %c0_92, %c0_93], %183 {strides = array<i32>} : memref<2x8x128xf32, #tpu.memory_space<vmem>>, vector<1x8x128xf32>,
    return
  }
  func.func @transform_0(%arg0: i32) -> (i32, i32) {
    %c0_i32 = arith.constant 0 : i32
    %c0_i32_0 = arith.constant 0 : i32
    %c0_i32_1 = arith.constant 0 : i32
    return %c0_i32, %c0_i32_0 : i32, i32
  }
  func.func @transform_1(%arg0: i32) -> (i32, i32) {
    %c0_i32 = arith.constant 0 : i32
    %c0_i32_0 = arith.constant 0 : i32
    %c0_i32_1 = arith.constant 0 : i32
    return %c0_i32, %c0_i32_0 : i32, i32
  }
  func.func @transform_2(%arg0: i32) -> (i32, i32) {
    %c0_i32 = arith.constant 0 : i32
    %c0_i32_0 = arith.constant 0 : i32
    %c0_i32_1 = arith.constant 0 : i32
    return %c0_i32, %c0_i32_0 : i32, i32
  }
  func.func @transform_3(%arg0: i32) -> (i32, i32) {
    %c0_i32 = arith.constant 0 : i32
    %c0_i32_0 = arith.constant 0 : i32
    %c0_i32_1 = arith.constant 0 : i32
    return %c0_i32, %c0_i32_0 : i32, i32
  }
  func.func @transform_4(%arg0: i32) -> (i32, i32) {
    %c0_i32 = arith.constant 0 : i32
    %c0_i32_0 = arith.constant 0 : i32
    %c0_i32_1 = arith.constant 0 : i32
    return %c0_i32, %c0_i32_0 : i32, i32
  }
  func.func @transform_5(%arg0: i32) -> (i32, i32) {
    %c0_i32 = arith.constant 0 : i32
    %c0_i32_0 = arith.constant 0 : i32
    %c0_i32_1 = arith.constant 0 : i32
    return %c0_i32, %c0_i32_0 : i32, i32
  }
  func.func @transform_6(%arg0: i32) -> (i32, i32, i32) {
    %c0_i32 = arith.constant 0 : i32
    %c0_i32_0 = arith.constant 0 : i32
    %c0_i32_1 = arith.constant 0 : i32
    %c0_i32_2 = arith.constant 0 : i32
    return %c0_i32, %c0_i32_0, %c0_i32_1 : i32, i32, i32
  }
}

</mosaic_0001>

<bundles_post_ra>
// kernel: layer_forward.1
= control target key start
LH: loop header
LB: loop body
LE: loop exit
PB: predicated region body
PF: predicated region fallthrough
CT: control target
= control target key end

     0   :  { %12 = vsyncpa [#allocation4], 0  ;;  %s2283_s0 = inlined_call_operand.hbm [shape: f32[64,128], index: 0, kind: input, shape index: {}]   ;;  %s2284_s1 = inlined_call_operand.hbm [shape: f32[8,128], index: 1, kind: input, shape index: {}]   ;;  %s2285_s2 = inlined_call_operand.hbm [shape: f32[128,128], index: 2, kind: input, shape index: {}]   ;;  %s2286_s3 = inlined_call_operand.hbm [shape: f32[128,128], index: 3, kind: input, shape index: {}]   ;;  %s2287_s4 = inlined_call_operand.vmem [shape: f32[1,128], index: 4, kind: input, shape index: {}]   ;;  %s2288_s5 = inlined_call_operand.hbm [shape: f32[64,128], index: 5, kind: output, shape index: {0}]   ;;  %s2289_s6 = inlined_call_operand.hbm [shape: f32[2,8,128], index: 6, kind: output, shape index: {1}]  }
   0x1   :  { %13 = vsyncpa [#allocation7], 0 }
   0x2   :  { %14 = vsyncpa [#allocation10], 0 }
   0x3   :  { %15 = vsyncpa [#allocation5], 0 }
   0x4   :  { %16 = vsyncpa [#allocation13], 0  ;;  %s1785_s21 = smov [#allocation6]   ;;  %s1786_s23 = smov [#allocation3]  }
   0x5   :  { %s35_s22 = sshll.u32 %s1785_s21, 4  ;;  %s22_s24 = sshll.u32 %s1786_s23, 4  ;;  %s36_s22 = int_to_ptr.vmem [resolvable:$true] %s35_s22  ;;  %s23_s24 = int_to_ptr.vmem [resolvable:$true] %s22_s24 }
   0x6   :  { %s1663_s25 = scalar_lea.vmem %s36_s22, 128  ;;  %p1668_p1 = scmp.lt.s32.totalorder %s36_s22, %s36_s22 }
   0x7   :  { %p1664_p0 = scmp.ne.s32.totalorder %s36_s22, %s1663_s25  ;;  %p1669_p2 = scmp.lt.s32.totalorder %s1663_s25, %s1663_s25 }
   0x9   :  { %p1670_p3 = por %p1669_p2, %p1668_p1 }
   0xb   :  { %p1671_p4 = pnand %p1670_p3, %p1664_p0 }
   0xd   :  { %1674 = shalt.err (!%p1671_p4)
}
   0xe   :  { %38 = dma.hbm_to_vmem [thread:$0]  %s2284_s1, 128, %s36_s22, [#allocation7]  }
   0xf   :  { %s1683_s28 = scalar_lea.vmem %s23_s24, 1024  ;;  %p1688_p6 = scmp.lt.s32.totalorder %s23_s24, %s23_s24 }
  0x10   :  { %p1684_p5 = scmp.ne.s32.totalorder %s23_s24, %s1683_s28  ;;  %p1689_p7 = scmp.lt.s32.totalorder %s1683_s28, %s1683_s28 }
  0x12   :  { %p1690_p8 = por %p1689_p7, %p1688_p6 }
  0x14   :  { %p1691_p9 = pnand %p1690_p8, %p1684_p5 }
  0x16   :  { %1694 = shalt.err (!%p1691_p9)
}
  0x17   :  { %s1787_s29 = smov 128   ;;  %s1788_s30 = smov 8  }
  0x18   :  { %28 = dma.hbm_to_vmem [thread:$0]  %s2283_s0, 1024, %s23_s24, [#allocation4], %s1787_s29, %s1787_s29, %s1788_s30  }
  0x19   :  { %s1789_s9 = smov [#allocation8]   ;;  %s1790_s11 = smov [#allocation9]  }
  0x1a   :  { %s44_s10 = sshll.u32 %s1789_s9, 4  ;;  %s56_s1 = sshll.u32 %s1790_s11, 4  ;;  %s45_s10 = int_to_ptr.vmem [resolvable:$true] %s44_s10  ;;  %s57_s1 = int_to_ptr.vmem [resolvable:$true] %s56_s1 }
  0x1b   :  { %s1703_s12 = scalar_lea.vmem %s45_s10, 2048  ;;  %p1708_p11 = scmp.lt.s32.totalorder %s45_s10, %s45_s10 }
  0x1c   :  { %p1704_p10 = scmp.ne.s32.totalorder %s45_s10, %s1703_s12  ;;  %p1709_p12 = scmp.lt.s32.totalorder %s1703_s12, %s1703_s12 }
  0x1e   :  { %p1710_p13 = por %p1709_p12, %p1708_p11 }
  0x20   :  { %p1711_p0 = pnand %p1710_p13, %p1704_p10 }
  0x22   :  { %1714 = shalt.err (!%p1711_p0)
}
  0x23   :  { %50 = dma.hbm_to_vmem [thread:$0]  %s2285_s2, 2048, %s45_s10, [#allocation7], %s1787_s29, %s1787_s29, %s1788_s30  }
  0x24   :  { %s1723_s0 = scalar_lea.vmem %s57_s1, 2048  ;;  %p1728_p2 = scmp.lt.s32.totalorder %s57_s1, %s57_s1 }
  0x25   :  { %p1724_p1 = scmp.ne.s32.totalorder %s57_s1, %s1723_s0  ;;  %p1729_p3 = scmp.lt.s32.totalorder %s1723_s0, %s1723_s0 }
  0x27   :  { %p1730_p4 = por %p1729_p3, %p1728_p2 }
  0x29   :  { %p1731_p5 = pnand %p1730_p4, %p1724_p1 }
  0x2b   :  { %1734 = shalt.err (!%p1731_p5)
}
  0x2c   :  { %62 = dma.hbm_to_vmem [thread:$0]  %s2286_s3, 2048, %s57_s1, [#allocation10], %s1787_s29, %s1787_s29, %s1788_s30  }
  0x2d   :  { %1775 = dma.done.wait [#allocation4], 1024  }
  0x2e   :  { %1776 = vsyncadd [#allocation4], 4294966272 }
  0x2f   :  { %1777 = dma.done.wait [#allocation7], 2176  }
  0x30   :  { %1778 = vsyncadd [#allocation7], 4294965120 }
  0x31   :  { %1779 = dma.done.wait [#allocation10], 2048  }
  0x32   :  { %1780 = vsyncadd [#allocation10], 4294965248  ;;  %v1791_v0 = vmov 0.0   ;;  %vm1792_vm0 = vmmov 0   ;;  %v92_v1 = vld [vmem:[#allocation8 + $0x70] sm:$0xff]  ;;  %v93_v2 = vld [vmem:[#allocation8 + $0x78] sm:$0xff] }
  0x33   :  { %1269 = vmatprep.subr.bf16.mxu1 %v1791_v0  ;;  %1285 = vmatprep.mubr.msk.bf16.mxu1 %vm1792_vm0, %v1791_v0  ;;  %v116_v3 = vld [vmem:[#allocation9 + $0x70] sm:$0xff]  ;;  %v1854_v4 = vpack.c.bf16 %v93_v2, %v92_v1  ;;  %v117_v5 = vld [vmem:[#allocation9 + $0x78] sm:$0xff]  ;;  %v90_v6 = vld [vmem:[#allocation8 + $0x60] sm:$0xff]  ;;  %s1794_s18 = smov [#allocation12]  }
  0x34   :  { %v91_v7 = vld [vmem:[#allocation8 + $0x68] sm:$0xff]  ;;  %v1856_v8 = vpack.c.bf16 %v117_v5, %v116_v3  ;;  %v114_v10 = vld [vmem:[#allocation9 + $0x60] sm:$0xff]  ;;  %v88_v12 = vld [vmem:[#allocation8 + $0x50] sm:$0xff]  ;;  %s1058_s19 = sshll.u32 %s1794_s18, 4  ;;  %s1059_s19 = int_to_ptr.vmem [resolvable:$true] %s1058_s19 }
  0x35   :  { %v1858_v9 = vpack.c.bf16 %v91_v7, %v90_v6  ;;  %v115_v11 = vld [vmem:[#allocation9 + $0x68] sm:$0xff]  ;;  %1245 = vmatprep.subr.bf16.mxu0 %v1854_v4  ;;  %v89_v13 = vld [vmem:[#allocation8 + $0x58] sm:$0xff]  ;;  %v112_v16 = vld [vmem:[#allocation9 + $0x50] sm:$0xff] }
  0x36   :  { %1270 = vmatpush3.bf16.msra.mxu1 %v1856_v8  ;;  %1246 = vmatpush3.bf16.msra.mxu0 %v1854_v4  ;;  %v1863_v14 = vpack.c.bf16 %v115_v11, %v114_v10  ;;  %v1867_v15 = vpack.c.bf16 %v89_v13, %v88_v12  ;;  %v113_v17 = vld [vmem:[#allocation9 + $0x58] sm:$0xff]  ;;  %v86_v18 = vld [vmem:[#allocation8 + $0x40] sm:$0xff]  ;;  %v87_v19 = vld [vmem:[#allocation8 + $0x48] sm:$0xff] }
  0x37   :  { %1271 = vmatprep.subr.bf16.mxu1 %v1791_v0  ;;  %1247 = vmatprep.subr.bf16.mxu0 %v1858_v9  ;;  %v1871_v20 = vpack.c.bf16 %v113_v17, %v112_v16  ;;  %v1875_v21 = vpack.c.bf16 %v87_v19, %v86_v18  ;;  %v110_v22 = vld [vmem:[#allocation9 + $0x40] sm:$0xff]  ;;  %v111_v23 = vld [vmem:[#allocation9 + $0x48] sm:$0xff]  ;;  %v84_v24 = vld [vmem:[#allocation8 + $0x30] sm:$0xff] }
  0x38   :  { %v85_v25 = vld [vmem:[#allocation8 + $0x38] sm:$0xff]  ;;  %v129_v27 = vld [vmem:[#allocation3 + $0x8] sm:$0xff]  ;;  %v1879_v28 = vpack.c.bf16 %v111_v23, %v110_v22  ;;  %v108_v31 = vld [vmem:[#allocation9 + $0x30] sm:$0xff] }
  0x39   :  { %v128_v26 = vld [vmem:[#allocation3] sm:$0xff]  ;;  %v1883_v30 = vpack.c.bf16 %v85_v25, %v84_v24  ;;  %v82_v33 = vld [vmem:[#allocation8 + $0x20] sm:$0xff]  ;;  %v83_v34 = vld [vmem:[#allocation8 + $0x28] sm:$0xff] }
  0x3a   :  { %1272 = vmatpush3.bf16.msra.mxu1 %v1863_v14  ;;  %1248 = vmatpush3.bf16.msra.mxu0 %v1858_v9  ;;  %v136_v29 = vpack.c.bf16 %v129_v27, %v128_v26  ;;  %v109_v32 = vld [vmem:[#allocation9 + $0x38] sm:$0xff]  ;;  %v1891_v36 = vpack.c.bf16 %v83_v34, %v82_v33  ;;  %v106_v37 = vld [vmem:[#allocation9 + $0x20] sm:$0xff]  ;;  %v107_v38 = vld [vmem:[#allocation9 + $0x28] sm:$0xff] }
  0x3b   :  { %1273 = vmatprep.subr.bf16.mxu1 %v1791_v0  ;;  %1249 = vmatprep.subr.bf16.mxu0 %v1867_v15  ;;  %v1887_v35 = vpack.c.bf16 %v109_v32, %v108_v31  ;;  %v80_v39 = vld [vmem:[#allocation8 + $0x10] sm:$0xff]  ;;  %v81_v40 = vld [vmem:[#allocation8 + $0x18] sm:$0xff]  ;;  %v1895_v41 = vpack.c.bf16 %v107_v38, %v106_v37  ;;  %v78_v45 = vld [vmem:[#allocation8] sm:$0xff] }
  0x3c   :  { %1261 = vmatprep.mubr.bf16.mxu0 %v136_v29  ;;  %v1899_v42 = vpack.c.bf16 %v81_v40, %v80_v39  ;;  %v104_v43 = vld [vmem:[#allocation9 + $0x10] sm:$0xff]  ;;  %v105_v44 = vld [vmem:[#allocation9 + $0x18] sm:$0xff]  ;;  %v79_v46 = vld [vmem:[#allocation8 + $0x8] sm:$0xff] }
  0x3d   :  { %v1903_v47 = vpack.c.bf16 %v105_v44, %v104_v43  ;;  %v1907_v48 = vpack.c.bf16 %v79_v46, %v78_v45  ;;  %v102_v49 = vld [vmem:[#allocation9] sm:$0xff]  ;;  %v103_v50 = vld [vmem:[#allocation9 + $0x8] sm:$0xff]  ;;  %v127_v52 = vld [vmem:[#allocation6] sm:$0xff] }
  0x3e   :  { %1274 = vmatpush3.bf16.msra.mxu1 %v1871_v20  ;;  %1250 = vmatpush3.bf16.msra.mxu0 %v1867_v15  ;;  %v1911_v51 = vpack.c.bf16 %v103_v50, %v102_v49  ;;  %v130_v53 = vld [vmem:[#allocation3 + $0x10] sm:$0xff]  ;;  %v131_v54 = vld [vmem:[#allocation3 + $0x18] sm:$0xff]  ;;  %v220_v55 = vpack.c.bf16 %v127_v52, %v127_v52  ;;  %v132_v57 = vld [vmem:[#allocation3 + $0x20] sm:$0xff] }
  0x3f   :  { %1275 = vmatprep.subr.bf16.mxu1 %v1791_v0  ;;  %1251 = vmatprep.subr.bf16.mxu0 %v1875_v21  ;;  %v137_v56 = vpack.c.bf16 %v131_v54, %v130_v53  ;;  %v133_v58 = vld [vmem:[#allocation3 + $0x28] sm:$0xff]  ;;  %v134_v60 = vld [vmem:[#allocation3 + $0x30] sm:$0xff]  ;;  %v135_v61 = vld [vmem:[#allocation3 + $0x38] sm:$0xff] }
  0x40   :  { %v138_v59 = vpack.c.bf16 %v133_v58, %v132_v57  ;;  %v139_v62 = vpack.c.bf16 %v135_v61, %v134_v60  ;;  %v1958_v2 = vld [vmem:[%s2287_s4] ss:$0 sm:$0xff]  ;;  %s1793_s4 = smov [#allocation11]  }
  0x41   :  { %s1046_s17 = sshll.u32 %s1793_s4, 4  ;;  %s1047_s17 = int_to_ptr.vmem [resolvable:$true] %s1046_s17 }
  0x42   :  { %1276 = vmatpush3.bf16.msra.mxu1 %v1879_v28  ;;  %1252 = vmatpush3.bf16.msra.mxu0 %v1875_v21  ;;  %s1735_s20 = scalar_lea.vmem %s1047_s17, 1024  ;;  %p1740_p7 = scmp.lt.s32.totalorder %s1047_s17, %s1047_s17 }
  0x43   :  { %1277 = vmatprep.subr.bf16.mxu1 %v1791_v0  ;;  %1253 = vmatprep.subr.bf16.mxu0 %v1883_v30  ;;  %p1736_p6 = scmp.ne.s32.totalorder %s1047_s17, %s1735_s20  ;;  %p1741_p8 = scmp.lt.s32.totalorder %s1735_s20, %s1735_s20 }
  0x45   :  { %p1742_p9 = por %p1741_p8, %p1740_p7 }
  0x46   :  { %1278 = vmatpush3.bf16.msra.mxu1 %v1887_v35  ;;  %1254 = vmatpush3.bf16.msra.mxu0 %v1883_v30 }
  0x47   :  { %1279 = vmatprep.subr.bf16.mxu1 %v1791_v0  ;;  %1255 = vmatprep.subr.bf16.mxu0 %v1891_v36  ;;  %p1743_p10 = pnand %p1742_p9, %p1736_p6 }
  0x4a   :  { %1280 = vmatpush3.bf16.msra.mxu1 %v1895_v41  ;;  %1256 = vmatpush3.bf16.msra.mxu0 %v1891_v36 }
  0x4b   :  { %1281 = vmatprep.subr.bf16.mxu1 %v1791_v0  ;;  %1257 = vmatprep.subr.bf16.mxu0 %v1899_v42 }
  0x4e   :  { %1282 = vmatpush3.bf16.msra.mxu1 %v1903_v47  ;;  %1258 = vmatpush3.bf16.msra.mxu0 %v1899_v42 }
  0x4f   :  { %1283 = vmatprep.subr.bf16.mxu1 %v1791_v0  ;;  %1259 = vmatprep.subr.bf16.mxu0 %v1907_v48 }
  0x52   :  { %1284 = vmatpush3.bf16.msra.mxu1 %v1911_v51  ;;  %1260 = vmatpush3.bf16.msra.mxu0 %v1907_v48 }
  0x53   :  { %1289 = vmatprep.subr.bf16.mxu0 %v1791_v0  ;;  %1309 = vmatprep.subr.bf16.mxu1 %v1791_v0 }
  0x55   :  { %1286 = vmatmul.mubr.bf16.vlgmr.msra.gmra.mxu1 %v220_v55  ;;  %1262 = vmatmul.mubr.bf16.vlgmr.msra.gmra.mxu0 %v137_v56 }
  0x56   :  { %1290 = vmatpush3.bf16.msra.mxu0 %v1856_v8  ;;  %1310 = vmatpush3.bf16.msra.mxu1 %v1856_v8 }
  0x57   :  { %1291 = vmatprep.subr.bf16.mxu0 %v1791_v0  ;;  %1311 = vmatprep.subr.bf16.mxu1 %v1791_v0 }
  0x58   :  { %1325 = vmatprep.mubr.msk.bf16.mxu1 %vm1792_vm0, %v1791_v0  ;;  %1265 = vmatprep.mubr.bf16.mxu0 %v138_v59 }
  0x5a   :  { %1292 = vmatpush3.bf16.msra.mxu0 %v1863_v14  ;;  %1312 = vmatpush3.bf16.msra.mxu1 %v1863_v14 }
  0x5b   :  { %1293 = vmatprep.subr.bf16.mxu0 %v1791_v0  ;;  %1313 = vmatprep.subr.bf16.mxu1 %v1791_v0 }
  0x5d   :  { %1266 = vmatmul.mubr.bf16.gmra.mxu0 %v139_v62 }
  0x5e   :  { %1294 = vmatpush3.bf16.msra.mxu0 %v1871_v20  ;;  %1314 = vmatpush3.bf16.msra.mxu1 %v1871_v20 }
  0x5f   :  { %1295 = vmatprep.subr.bf16.mxu0 %v1791_v0  ;;  %1315 = vmatprep.subr.bf16.mxu1 %v1791_v0 }
  0x60   :  { %1305 = vmatprep.mubr.msk.bf16.mxu0 %vm1792_vm0, %v1791_v0 }
  0x62   :  { %1296 = vmatpush3.bf16.msra.mxu0 %v1879_v28  ;;  %1316 = vmatpush3.bf16.msra.mxu1 %v1879_v28 }
  0x63   :  { %1297 = vmatprep.subr.bf16.mxu0 %v1791_v0  ;;  %1317 = vmatprep.subr.bf16.mxu1 %v1791_v0 }
  0x66   :  { %1298 = vmatpush3.bf16.msra.mxu0 %v1887_v35  ;;  %1318 = vmatpush3.bf16.msra.mxu1 %v1887_v35 }
  0x67   :  { %1299 = vmatprep.subr.bf16.mxu0 %v1791_v0  ;;  %1319 = vmatprep.subr.bf16.mxu1 %v1791_v0 }
  0x6a   :  { %1300 = vmatpush3.bf16.msra.mxu0 %v1895_v41  ;;  %1320 = vmatpush3.bf16.msra.mxu1 %v1895_v41 }
  0x6b   :  { %1301 = vmatprep.subr.bf16.mxu0 %v1791_v0  ;;  %1321 = vmatprep.subr.bf16.mxu1 %v1791_v0 }
  0x6e   :  { %1302 = vmatpush3.bf16.msra.mxu0 %v1903_v47  ;;  %1322 = vmatpush3.bf16.msra.mxu1 %v1903_v47 }
  0x6f   :  { %1303 = vmatprep.subr.bf16.mxu0 %v1791_v0  ;;  %1323 = vmatprep.subr.bf16.mxu1 %v1791_v0 }
  0x72   :  { %1304 = vmatpush3.bf16.msra.mxu0 %v1911_v51  ;;  %1324 = vmatpush3.bf16.msra.mxu1 %v1911_v51 }
  0x73   :  { %1329 = vmatprep.subr.bf16.mxu0 %v1791_v0  ;;  %1349 = vmatprep.subr.bf16.mxu1 %v1791_v0 }
 0x115   :  { %v255_v63 = vpop.f32.mrf.mxu1  ;;  %v1263_v1 = vpop.f32.mrf.mxu0 }
 0x116   :  { %v189_v34 = vadd.f32 %v1263_v1, %v1958_v2 }
 0x117   :  { %v1287_v3 = vpop.f32.mrf.mxu1  ;;  %v180_v5 = vpop.f32.mrf.mxu0 }
 0x118   :  { %v181_v6 = vadd.f32 %v1958_v2, %v180_v5 }
 0x119   :  { %v258_v7 = vpop.f32.mrf.mxu1  ;;  %v1264_v16 = vpop.f32.mrf.mxu0 }
 0x11a   :  { %v261_v10 = vadd.f32 %v255_v63, %v181_v6  ;;  %v192_v46 = vadd.f32 %v1264_v16, %v1958_v2 }
 0x11b   :  { %v1288_v11 = vpop.f32.mrf.mxu1  ;;  %v183_v17 = vpop.f32.mrf.mxu0 }
 0x11c   :  { %1623 = vtanh.f32 %v261_v10  ;;  %v184_v24 = vadd.f32 %v1958_v2, %v183_v17 }
 0x11d   :  { %v1983_v18 = vpop.f32.mrf.mxu0 }
 0x11f   :  { %v1985_v19 = vpop.f32.mrf.mxu0 }
 0x120   :  { %v197_v57 = vadd.f32 %v1958_v2, %v1985_v19 }
 0x121   :  { %v1987_v22 = vpop.f32.mrf.mxu0 }
 0x123   :  { %v1989_v23 = vpop.f32.mrf.mxu0 }
 0x124   :  { %v200_v3 = vadd.f32 %v1958_v2, %v1989_v23 }
 0x129   :  { %v1961_v12 = vpop.eup %1623 }
 0x12a   :  { %v266_v13 = vpack.c.bf16 %v1961_v12, %v1961_v12 }
 0x12c   :  { %1306 = vmatmul.mubr.bf16.vlgmr.msra.gmra.mxu0 %v266_v13 }
 0x12d   :  { %1330 = vmatpush3.bf16.msra.mxu0 %v1856_v8  ;;  %1345 = vmatprep.mubr.msk.bf16.mxu0 %vm1792_vm0, %v1791_v0 }
 0x12e   :  { %1331 = vmatprep.subr.bf16.mxu0 %v1791_v0 }
 0x131   :  { %1332 = vmatpush3.bf16.msra.mxu0 %v1863_v14 }
 0x132   :  { %1333 = vmatprep.subr.bf16.mxu0 %v1791_v0 }
 0x135   :  { %1334 = vmatpush3.bf16.msra.mxu0 %v1871_v20 }
 0x136   :  { %1335 = vmatprep.subr.bf16.mxu0 %v1791_v0 }
 0x139   :  { %1336 = vmatpush3.bf16.msra.mxu0 %v1879_v28 }
 0x13a   :  { %1337 = vmatprep.subr.bf16.mxu0 %v1791_v0 }
 0x13d   :  { %1338 = vmatpush3.bf16.msra.mxu0 %v1887_v35 }
 0x13e   :  { %1339 = vmatprep.subr.bf16.mxu0 %v1791_v0 }
 0x141   :  { %1340 = vmatpush3.bf16.msra.mxu0 %v1895_v41 }
 0x142   :  { %1341 = vmatprep.subr.bf16.mxu0 %v1791_v0 }
 0x145   :  { %1342 = vmatpush3.bf16.msra.mxu0 %v1903_v47 }
 0x146   :  { %1343 = vmatprep.subr.bf16.mxu0 %v1791_v0 }
 0x149   :  { %1344 = vmatpush3.bf16.msra.mxu0 %v1911_v51 }
 0x14a   :  { %1369 = vmatprep.subr.bf16.mxu0 %v1791_v0 }
 0x1ec   :  { %v301_v25 = vpop.f32.mrf.mxu0 }
 0x1ed   :  { %v307_v26 = vadd.f32 %v301_v25, %v184_v24 }
 0x1ee   :  { %v1307_v27 = vpop.f32.mrf.mxu0 }
 0x1ef   :  { %1625 = vtanh.f32 %v307_v26 }
 0x1f0   :  { %v304_v29 = vpop.f32.mrf.mxu0 }
 0x1f2   :  { %v1308_v31 = vpop.f32.mrf.mxu0 }
 0x1fc   :  { %v1992_v32 = vpop.eup %1625 }
 0x1fd   :  { %v312_v33 = vpack.c.bf16 %v1992_v32, %v1992_v32  ;;  %v595_v17 = vpack.c.bf16 %v1992_v32, %v1961_v12 }
 0x1ff   :  { %1326 = vmatmul.mubr.bf16.vlgmr.msra.gmra.mxu1 %v312_v33 }
 0x200   :  { %1350 = vmatpush3.bf16.msra.mxu1 %v1856_v8  ;;  %1365 = vmatprep.mubr.msk.bf16.mxu1 %vm1792_vm0, %v1791_v0 }
 0x201   :  { %1351 = vmatprep.subr.bf16.mxu1 %v1791_v0 }
 0x204   :  { %1352 = vmatpush3.bf16.msra.mxu1 %v1863_v14 }
 0x205   :  { %1353 = vmatprep.subr.bf16.mxu1 %v1791_v0 }
 0x208   :  { %1354 = vmatpush3.bf16.msra.mxu1 %v1871_v20 }
 0x209   :  { %1355 = vmatprep.subr.bf16.mxu1 %v1791_v0 }
 0x20c   :  { %1356 = vmatpush3.bf16.msra.mxu1 %v1879_v28 }
 0x20d   :  { %1357 = vmatprep.subr.bf16.mxu1 %v1791_v0 }
 0x210   :  { %1358 = vmatpush3.bf16.msra.mxu1 %v1887_v35 }
 0x211   :  { %1359 = vmatprep.subr.bf16.mxu1 %v1791_v0 }
 0x214   :  { %1360 = vmatpush3.bf16.msra.mxu1 %v1895_v41 }
 0x215   :  { %1361 = vmatprep.subr.bf16.mxu1 %v1791_v0 }
 0x218   :  { %1362 = vmatpush3.bf16.msra.mxu1 %v1903_v47 }
 0x219   :  { %1363 = vmatprep.subr.bf16.mxu1 %v1791_v0 }
 0x21c   :  { %1364 = vmatpush3.bf16.msra.mxu1 %v1911_v51 }
 0x21d   :  { %1389 = vmatprep.subr.bf16.mxu1 %v1791_v0 }
 0x2bf   :  { %v347_v37 = vpop.f32.mrf.mxu1 }
 0x2c0   :  { %v353_v38 = vadd.f32 %v347_v37, %v189_v34 }
 0x2c1   :  { %v1327_v39 = vpop.f32.mrf.mxu1 }
 0x2c2   :  { %1627 = vtanh.f32 %v353_v38 }
 0x2c3   :  { %v350_v40 = vpop.f32.mrf.mxu1 }
 0x2c5   :  { %v1328_v43 = vpop.f32.mrf.mxu1 }
 0x2cf   :  { %v2015_v44 = vpop.eup %1627 }
 0x2d0   :  { %v358_v45 = vpack.c.bf16 %v2015_v44, %v2015_v44 }
 0x2d2   :  { %1346 = vmatmul.mubr.bf16.vlgmr.msra.gmra.mxu0 %v358_v45 }
 0x2d3   :  { %1370 = vmatpush3.bf16.msra.mxu0 %v1856_v8  ;;  %1385 = vmatprep.mubr.msk.bf16.mxu0 %vm1792_vm0, %v1791_v0 }
 0x2d4   :  { %1371 = vmatprep.subr.bf16.mxu0 %v1791_v0 }
 0x2d7   :  { %1372 = vmatpush3.bf16.msra.mxu0 %v1863_v14 }
 0x2d8   :  { %1373 = vmatprep.subr.bf16.mxu0 %v1791_v0 }
 0x2db   :  { %1374 = vmatpush3.bf16.msra.mxu0 %v1871_v20 }
 0x2dc   :  { %1375 = vmatprep.subr.bf16.mxu0 %v1791_v0 }
 0x2df   :  { %1376 = vmatpush3.bf16.msra.mxu0 %v1879_v28 }
 0x2e0   :  { %1377 = vmatprep.subr.bf16.mxu0 %v1791_v0 }
 0x2e3   :  { %1378 = vmatpush3.bf16.msra.mxu0 %v1887_v35 }
 0x2e4   :  { %1379 = vmatprep.subr.bf16.mxu0 %v1791_v0 }
 0x2e7   :  { %1380 = vmatpush3.bf16.msra.mxu0 %v1895_v41 }
 0x2e8   :  { %1381 = vmatprep.subr.bf16.mxu0 %v1791_v0 }
 0x2eb   :  { %1382 = vmatpush3.bf16.msra.mxu0 %v1903_v47 }
 0x2ec   :  { %1383 = vmatprep.subr.bf16.mxu0 %v1791_v0 }
 0x2ef   :  { %1384 = vmatpush3.bf16.msra.mxu0 %v1911_v51 }
 0x2f0   :  { %1409 = vmatprep.subr.bf16.mxu0 %v1791_v0 }
 0x392   :  { %v393_v49 = vpop.f32.mrf.mxu0 }
 0x393   :  { %v399_v50 = vadd.f32 %v393_v49, %v192_v46 }
 0x394   :  { %v1347_v52 = vpop.f32.mrf.mxu0 }
 0x395   :  { %1629 = vtanh.f32 %v399_v50 }
 0x396   :  { %v396_v53 = vpop.f32.mrf.mxu0 }
 0x398   :  { %v1348_v54 = vpop.f32.mrf.mxu0 }
 0x3a2   :  { %v2038_v55 = vpop.eup %1629 }
 0x3a3   :  { %v404_v56 = vpack.c.bf16 %v2038_v55, %v2038_v55 }
 0x3a5   :  { %1366 = vmatmul.mubr.bf16.vlgmr.msra.gmra.mxu1 %v404_v56 }
 0x3a6   :  { %1390 = vmatpush3.bf16.msra.mxu1 %v1856_v8  ;;  %1405 = vmatprep.mubr.msk.bf16.mxu1 %vm1792_vm0, %v1791_v0 }
 0x3a7   :  { %1391 = vmatprep.subr.bf16.mxu1 %v1791_v0 }
 0x3aa   :  { %1392 = vmatpush3.bf16.msra.mxu1 %v1863_v14 }
 0x3ab   :  { %1393 = vmatprep.subr.bf16.mxu1 %v1791_v0 }
 0x3ae   :  { %1394 = vmatpush3.bf16.msra.mxu1 %v1871_v20 }
 0x3af   :  { %1395 = vmatprep.subr.bf16.mxu1 %v1791_v0 }
 0x3b2   :  { %1396 = vmatpush3.bf16.msra.mxu1 %v1879_v28 }
 0x3b3   :  { %1397 = vmatprep.subr.bf16.mxu1 %v1791_v0 }
 0x3b6   :  { %1398 = vmatpush3.bf16.msra.mxu1 %v1887_v35 }
 0x3b7   :  { %1399 = vmatprep.subr.bf16.mxu1 %v1791_v0 }
 0x3ba   :  { %1400 = vmatpush3.bf16.msra.mxu1 %v1895_v41 }
 0x3bb   :  { %1401 = vmatprep.subr.bf16.mxu1 %v1791_v0 }
 0x3be   :  { %1402 = vmatpush3.bf16.msra.mxu1 %v1903_v47 }
 0x3bf   :  { %1403 = vmatprep.subr.bf16.mxu1 %v1791_v0 }
 0x3c2   :  { %1404 = vmatpush3.bf16.msra.mxu1 %v1911_v51 }
 0x3c3   :  { %1429 = vmatprep.subr.bf16.mxu1 %v1854_v4 }
 0x465   :  { %v439_v58 = vpop.f32.mrf.mxu1 }
 0x466   :  { %v445_v59 = vadd.f32 %v439_v58, %v197_v57 }
 0x467   :  { %v1367_v60 = vpop.f32.mrf.mxu1 }
 0x468   :  { %1631 = vtanh.f32 %v445_v59 }
 0x469   :  { %v442_v61 = vpop.f32.mrf.mxu1 }
 0x46b   :  { %v1368_v62 = vpop.f32.mrf.mxu1 }
 0x475   :  { %v1632_v63 = vpop.eup %1631 }
 0x476   :  { %v450_v1 = vpack.c.bf16 %v1632_v63, %v1632_v63 }
 0x478   :  { %1386 = vmatmul.mubr.bf16.vlgmr.msra.gmra.mxu0 %v450_v1 }
 0x479   :  { %1410 = vmatpush3.bf16.msra.mxu0 %v1856_v8  ;;  %1425 = vmatprep.mubr.msk.bf16.mxu0 %vm1792_vm0, %v1791_v0 }
 0x47a   :  { %1411 = vmatprep.subr.bf16.mxu0 %v1791_v0 }
 0x47d   :  { %1412 = vmatpush3.bf16.msra.mxu0 %v1863_v14 }
 0x47e   :  { %1413 = vmatprep.subr.bf16.mxu0 %v1791_v0 }
 0x481   :  { %1414 = vmatpush3.bf16.msra.mxu0 %v1871_v20 }
 0x482   :  { %1415 = vmatprep.subr.bf16.mxu0 %v1791_v0 }
 0x485   :  { %1416 = vmatpush3.bf16.msra.mxu0 %v1879_v28 }
 0x486   :  { %1417 = vmatprep.subr.bf16.mxu0 %v1791_v0 }
 0x489   :  { %1418 = vmatpush3.bf16.msra.mxu0 %v1887_v35 }
 0x48a   :  { %1419 = vmatprep.subr.bf16.mxu0 %v1791_v0 }
 0x48d   :  { %1420 = vmatpush3.bf16.msra.mxu0 %v1895_v41 }
 0x48e   :  { %1421 = vmatprep.subr.bf16.mxu0 %v1791_v0 }
 0x491   :  { %1422 = vmatpush3.bf16.msra.mxu0 %v1903_v47 }
 0x492   :  { %1423 = vmatprep.subr.bf16.mxu0 %v1791_v0 }
 0x495   :  { %1424 = vmatpush3.bf16.msra.mxu0 %v1911_v51 }
 0x496   :  { %1453 = vmatprep.subr.bf16.mxu0 %v1791_v0 }
 0x538   :  { %v485_v5 = vpop.f32.mrf.mxu0 }
 0x539   :  { %v491_v6 = vadd.f32 %v485_v5, %v200_v3 }
 0x53a   :  { %v1387_v7 = vpop.f32.mrf.mxu0 }
 0x53b   :  { %1633 = vtanh.f32 %v491_v6 }
 0x53c   :  { %v488_v10 = vpop.f32.mrf.mxu0 }
 0x53e   :  { %v1388_v11 = vpop.f32.mrf.mxu0 }
 0x548   :  { %v1634_v13 = vpop.eup %1633 }
 0x549   :  { %v496_v16 = vpack.c.bf16 %v1634_v13, %v1634_v13 }
 0x54b   :  { %1406 = vmatmul.mubr.bf16.vlgmr.msra.gmra.mxu1 %v496_v16 }
 0x54c   :  { %1430 = vmatpush3.bf16.msra.mxu1 %v1854_v4  ;;  %1445 = vmatprep.mubr.bf16.mxu1 %v595_v17  ;;  %v596_v4 = vpack.c.bf16 %v2038_v55, %v2015_v44 }
 0x54d   :  { %1431 = vmatprep.subr.bf16.mxu1 %v1858_v9 }
 0x550   :  { %1432 = vmatpush3.bf16.msra.mxu1 %v1858_v9  ;;  %v597_v9 = vpack.c.bf16 %v1634_v13, %v1632_v63 }
 0x551   :  { %1433 = vmatprep.subr.bf16.mxu1 %v1867_v15 }
 0x554   :  { %1434 = vmatpush3.bf16.msra.mxu1 %v1867_v15  ;;  %v205_v15 = vadd.f32 %v1983_v18, %v1958_v2  ;;  %v208_v18 = vadd.f32 %v1987_v22, %v1958_v2 }
 0x555   :  { %1435 = vmatprep.subr.bf16.mxu1 %v1875_v21 }
 0x558   :  { %1436 = vmatpush3.bf16.msra.mxu1 %v1875_v21 }
 0x559   :  { %1437 = vmatprep.subr.bf16.mxu1 %v1883_v30 }
 0x55c   :  { %1438 = vmatpush3.bf16.msra.mxu1 %v1883_v30 }
 0x55d   :  { %1439 = vmatprep.subr.bf16.mxu1 %v1891_v36 }
 0x560   :  { %1440 = vmatpush3.bf16.msra.mxu1 %v1891_v36 }
 0x561   :  { %1441 = vmatprep.subr.bf16.mxu1 %v1899_v42 }
 0x564   :  { %1442 = vmatpush3.bf16.msra.mxu1 %v1899_v42 }
 0x565   :  { %1443 = vmatprep.subr.bf16.mxu1 %v1907_v48 }
 0x568   :  { %1444 = vmatpush3.bf16.msra.mxu1 %v1907_v48 }
 0x569   :  { %1473 = vmatprep.subr.bf16.mxu1 %v1791_v0 }
 0x56b   :  { %1446 = vmatmul.mubr.bf16.vlgmr.msra.gmra.mxu1 %v596_v4 }
 0x56c   :  { %1449 = vmatprep.mubr.bf16.mxu1 %v597_v9  ;;  %1474 = vmatpush3.bf16.msra.mxu1 %v1856_v8 }
 0x56d   :  { %1475 = vmatprep.subr.bf16.mxu1 %v1791_v0 }
 0x570   :  { %1476 = vmatpush3.bf16.msra.mxu1 %v1863_v14 }
 0x571   :  { %1477 = vmatprep.subr.bf16.mxu1 %v1791_v0 }
 0x574   :  { %1478 = vmatpush3.bf16.msra.mxu1 %v1871_v20 }
 0x575   :  { %1479 = vmatprep.subr.bf16.mxu1 %v1791_v0 }
 0x578   :  { %1480 = vmatpush3.bf16.msra.mxu1 %v1879_v28 }
 0x579   :  { %1481 = vmatprep.subr.bf16.mxu1 %v1791_v0 }
 0x57c   :  { %1482 = vmatpush3.bf16.msra.mxu1 %v1887_v35 }
 0x57d   :  { %1483 = vmatprep.subr.bf16.mxu1 %v1791_v0 }
 0x580   :  { %1484 = vmatpush3.bf16.msra.mxu1 %v1895_v41 }
 0x581   :  { %1485 = vmatprep.subr.bf16.mxu1 %v1791_v0 }
 0x584   :  { %1486 = vmatpush3.bf16.msra.mxu1 %v1903_v47 }
 0x585   :  { %1487 = vmatprep.subr.bf16.mxu1 %v1791_v0 }
 0x588   :  { %1488 = vmatpush3.bf16.msra.mxu1 %v1911_v51 }
 0x589   :  { %1513 = vmatprep.subr.bf16.mxu1 %v1791_v0 }
 0x60b   :  { %v531_v21 = vpop.f32.mrf.mxu1 }
 0x60c   :  { %v537_v30 = vadd.f32 %v531_v21, %v205_v15 }
 0x60d   :  { %v1407_v36 = vpop.f32.mrf.mxu1 }
 0x60e   :  { %1635 = vtanh.f32 %v537_v30 }
 0x60f   :  { %v534_v42 = vpop.f32.mrf.mxu1 }
 0x611   :  { %v1408_v48 = vpop.f32.mrf.mxu1 }
 0x61b   :  { %v1636_v12 = vpop.eup %1635 }
 0x61c   :  { %v542_v19 = vpack.c.bf16 %v1636_v12, %v1636_v12 }
 0x61e   :  { %1426 = vmatmul.mubr.bf16.vlgmr.msra.gmra.mxu0 %v542_v19 }
 0x61f   :  { %1454 = vmatpush3.bf16.msra.mxu0 %v1856_v8  ;;  %1469 = vmatprep.mubr.msk.bf16.mxu0 %vm1792_vm0, %v1791_v0 }
 0x620   :  { %1455 = vmatprep.subr.bf16.mxu0 %v1791_v0 }
 0x623   :  { %1456 = vmatpush3.bf16.msra.mxu0 %v1863_v14 }
 0x624   :  { %1457 = vmatprep.subr.bf16.mxu0 %v1791_v0 }
 0x627   :  { %1458 = vmatpush3.bf16.msra.mxu0 %v1871_v20 }
 0x628   :  { %1459 = vmatprep.subr.bf16.mxu0 %v1791_v0 }
 0x62b   :  { %1460 = vmatpush3.bf16.msra.mxu0 %v1879_v28  ;;  %v2160_v22 = vpop.f32.mrf.mxu1 }
 0x62c   :  { %1461 = vmatprep.subr.bf16.mxu0 %v1791_v0  ;;  %v642_v63 = vadd.f32 %v2160_v22, %v1958_v2 }
 0x62d   :  { %v633_v33 = vpop.f32.mrf.mxu1 }
 0x62e   :  { %v634_v34 = vadd.f32 %v1958_v2, %v633_v33 }
 0x62f   :  { %1462 = vmatpush3.bf16.msra.mxu0 %v1887_v35  ;;  %v1448_v46 = vpop.f32.mrf.mxu1 }
 0x630   :  { %1463 = vmatprep.subr.bf16.mxu0 %v1791_v0  ;;  %v645_v13 = vadd.f32 %v1448_v46, %v1958_v2 }
 0x631   :  { %v636_v49 = vpop.f32.mrf.mxu1 }
 0x632   :  { %v637_v55 = vadd.f32 %v1958_v2, %v636_v49 }
 0x633   :  { %1464 = vmatpush3.bf16.msra.mxu0 %v1895_v41 }
 0x634   :  { %1465 = vmatprep.subr.bf16.mxu0 %v1791_v0 }
 0x637   :  { %1466 = vmatpush3.bf16.msra.mxu0 %v1903_v47 }
 0x638   :  { %1467 = vmatprep.subr.bf16.mxu0 %v1791_v0 }
 0x63b   :  { %1468 = vmatpush3.bf16.msra.mxu0 %v1911_v51 }
 0x63c   :  { %1493 = vmatprep.subr.bf16.mxu0 %v1791_v0 }
 0x6de   :  { %v577_v23 = vpop.f32.mrf.mxu0 }
 0x6df   :  { %v583_v24 = vadd.f32 %v577_v23, %v208_v18 }
 0x6e0   :  { %v1427_v25 = vpop.f32.mrf.mxu0 }
 0x6e1   :  { %1637 = vtanh.f32 %v583_v24 }
 0x6e2   :  { %v580_v26 = vpop.f32.mrf.mxu0 }
 0x6e4   :  { %v1428_v27 = vpop.f32.mrf.mxu0 }
 0x6ee   :  { %v1638_v29 = vpop.eup %1637 }
 0x6ef   :  { %586 = vst [vmem:[#allocation12] sm:$0xff] %v1638_v29  ;;  %v598_v31 = vpack.c.bf16 %v1638_v29, %v1636_v12  ;;  %v673_v32 = vpack.c.bf16 %v1638_v29, %v1638_v29 }
 0x6f1   :  { %1450 = vmatmul.mubr.bf16.gmra.mxu1 %v598_v31  ;;  %1470 = vmatmul.mubr.bf16.vlgmr.msra.gmra.mxu0 %v673_v32 }
 0x6f2   :  { %1489 = vmatprep.mubr.msk.bf16.mxu1 %vm1792_vm0, %v1791_v0  ;;  %1494 = vmatpush3.bf16.msra.mxu0 %v1856_v8 }
 0x6f3   :  { %1495 = vmatprep.subr.bf16.mxu0 %v1791_v0  ;;  %1509 = vmatprep.mubr.msk.bf16.mxu0 %vm1792_vm0, %v1791_v0 }
 0x6f6   :  { %1496 = vmatpush3.bf16.msra.mxu0 %v1863_v14 }
 0x6f7   :  { %1497 = vmatprep.subr.bf16.mxu0 %v1791_v0 }
 0x6fa   :  { %1498 = vmatpush3.bf16.msra.mxu0 %v1871_v20 }
 0x6fb   :  { %1499 = vmatprep.subr.bf16.mxu0 %v1791_v0 }
 0x6fe   :  { %1500 = vmatpush3.bf16.msra.mxu0 %v1879_v28 }
 0x6ff   :  { %1501 = vmatprep.subr.bf16.mxu0 %v1791_v0 }
 0x702   :  { %1502 = vmatpush3.bf16.msra.mxu0 %v1887_v35 }
 0x703   :  { %1503 = vmatprep.subr.bf16.mxu0 %v1791_v0 }
 0x706   :  { %1504 = vmatpush3.bf16.msra.mxu0 %v1895_v41 }
 0x707   :  { %1505 = vmatprep.subr.bf16.mxu0 %v1791_v0 }
 0x70a   :  { %1506 = vmatpush3.bf16.msra.mxu0 %v1903_v47 }
 0x70b   :  { %1507 = vmatprep.subr.bf16.mxu0 %v1791_v0 }
 0x70e   :  { %1508 = vmatpush3.bf16.msra.mxu0 %v1911_v51 }
 0x70f   :  { %1533 = vmatprep.subr.bf16.mxu0 %v1791_v0 }
 0x7b1   :  { %v708_v37 = vpop.f32.mrf.mxu0  ;;  %v2181_v50 = vpop.f32.mrf.mxu1 }
 0x7b2   :  { %v714_v38 = vadd.f32 %v708_v37, %v634_v34 }
 0x7b3   :  { %v1471_v39 = vpop.f32.mrf.mxu0  ;;  %v2183_v52 = vpop.f32.mrf.mxu1 }
 0x7b4   :  { %1639 = vtanh.f32 %v714_v38  ;;  %v650_v36 = vadd.f32 %v1958_v2, %v2183_v52 }
 0x7b5   :  { %v711_v40 = vpop.f32.mrf.mxu0  ;;  %v2185_v53 = vpop.f32.mrf.mxu1 }
 0x7b6   :  { %v661_v33 = vadd.f32 %v2185_v53, %v1958_v2 }
 0x7b7   :  { %v1472_v43 = vpop.f32.mrf.mxu0  ;;  %v2187_v54 = vpop.f32.mrf.mxu1 }
 0x7c1   :  { %v1640_v44 = vpop.eup %1639 }
 0x7c2   :  { %716 = vst [vmem:[#allocation11] sm:$0xff] %v1640_v44  ;;  %v718_v45 = vpack.c.bf16 %v1640_v44, %v1640_v44 }
 0x7c4   :  { %1490 = vmatmul.mubr.bf16.vlgmr.msra.gmra.mxu1 %v718_v45 }
 0x7c5   :  { %1514 = vmatpush3.bf16.msra.mxu1 %v1856_v8  ;;  %1529 = vmatprep.mubr.msk.bf16.mxu1 %vm1792_vm0, %v1791_v0 }
 0x7c6   :  { %1515 = vmatprep.subr.bf16.mxu1 %v1791_v0 }
 0x7c9   :  { %1516 = vmatpush3.bf16.msra.mxu1 %v1863_v14 }
 0x7ca   :  { %1517 = vmatprep.subr.bf16.mxu1 %v1791_v0 }
 0x7cd   :  { %1518 = vmatpush3.bf16.msra.mxu1 %v1871_v20 }
 0x7ce   :  { %1519 = vmatprep.subr.bf16.mxu1 %v1791_v0 }
 0x7d1   :  { %1520 = vmatpush3.bf16.msra.mxu1 %v1879_v28 }
 0x7d2   :  { %1521 = vmatprep.subr.bf16.mxu1 %v1791_v0 }
 0x7d5   :  { %1522 = vmatpush3.bf16.msra.mxu1 %v1887_v35 }
 0x7d6   :  { %1523 = vmatprep.subr.bf16.mxu1 %v1791_v0 }
 0x7d9   :  { %1524 = vmatpush3.bf16.msra.mxu1 %v1895_v41 }
 0x7da   :  { %1525 = vmatprep.subr.bf16.mxu1 %v1791_v0 }
 0x7dd   :  { %1526 = vmatpush3.bf16.msra.mxu1 %v1903_v47 }
 0x7de   :  { %1527 = vmatprep.subr.bf16.mxu1 %v1791_v0 }
 0x7e1   :  { %1528 = vmatpush3.bf16.msra.mxu1 %v1911_v51 }
 0x7e2   :  { %1553 = vmatprep.subr.bf16.mxu1 %v1791_v0 }
 0x884   :  { %v753_v56 = vpop.f32.mrf.mxu1 }
 0x885   :  { %v759_v57 = vadd.f32 %v753_v56, %v637_v55 }
 0x886   :  { %v1491_v58 = vpop.f32.mrf.mxu1 }
 0x887   :  { %1641 = vtanh.f32 %v759_v57 }
 0x888   :  { %v756_v59 = vpop.f32.mrf.mxu1 }
 0x88a   :  { %v1492_v60 = vpop.f32.mrf.mxu1 }
 0x894   :  { %v1642_v61 = vpop.eup %1641 }
 0x895   :  { %762 = vst [vmem:[#allocation11 + $0x8] sm:$0xff] %v1642_v61  ;;  %v764_v62 = vpack.c.bf16 %v1642_v61, %v1642_v61 }
 0x897   :  { %1510 = vmatmul.mubr.bf16.vlgmr.msra.gmra.mxu0 %v764_v62 }
 0x898   :  { %1534 = vmatpush3.bf16.msra.mxu0 %v1856_v8  ;;  %1549 = vmatprep.mubr.msk.bf16.mxu0 %vm1792_vm0, %v1791_v0 }
 0x899   :  { %1535 = vmatprep.subr.bf16.mxu0 %v1791_v0 }
 0x89c   :  { %1536 = vmatpush3.bf16.msra.mxu0 %v1863_v14 }
 0x89d   :  { %1537 = vmatprep.subr.bf16.mxu0 %v1791_v0 }
 0x8a0   :  { %1538 = vmatpush3.bf16.msra.mxu0 %v1871_v20 }
 0x8a1   :  { %1539 = vmatprep.subr.bf16.mxu0 %v1791_v0 }
 0x8a4   :  { %1540 = vmatpush3.bf16.msra.mxu0 %v1879_v28 }
 0x8a5   :  { %1541 = vmatprep.subr.bf16.mxu0 %v1791_v0 }
 0x8a8   :  { %1542 = vmatpush3.bf16.msra.mxu0 %v1887_v35 }
 0x8a9   :  { %1543 = vmatprep.subr.bf16.mxu0 %v1791_v0 }
 0x8ac   :  { %1544 = vmatpush3.bf16.msra.mxu0 %v1895_v41 }
 0x8ad   :  { %1545 = vmatprep.subr.bf16.mxu0 %v1791_v0 }
 0x8b0   :  { %1546 = vmatpush3.bf16.msra.mxu0 %v1903_v47 }
 0x8b1   :  { %1547 = vmatprep.subr.bf16.mxu0 %v1791_v0 }
 0x8b4   :  { %1548 = vmatpush3.bf16.msra.mxu0 %v1911_v51 }
 0x8b5   :  { %1573 = vmatprep.subr.bf16.mxu0 %v1791_v0 }
 0x957   :  { %v799_v1 = vpop.f32.mrf.mxu0 }
 0x958   :  { %v805_v3 = vadd.f32 %v799_v1, %v642_v63 }
 0x959   :  { %v1511_v5 = vpop.f32.mrf.mxu0 }
 0x95a   :  { %1643 = vtanh.f32 %v805_v3 }
 0x95b   :  { %v802_v6 = vpop.f32.mrf.mxu0 }
 0x95d   :  { %v1512_v7 = vpop.f32.mrf.mxu0 }
 0x967   :  { %v1644_v10 = vpop.eup %1643 }
 0x968   :  { %808 = vst [vmem:[#allocation11 + $0x10] sm:$0xff] %v1644_v10  ;;  %v810_v11 = vpack.c.bf16 %v1644_v10, %v1644_v10 }
 0x96a   :  { %1530 = vmatmul.mubr.bf16.vlgmr.msra.gmra.mxu1 %v810_v11 }
 0x96b   :  { %1554 = vmatpush3.bf16.msra.mxu1 %v1856_v8  ;;  %1569 = vmatprep.mubr.msk.bf16.mxu1 %vm1792_vm0, %v1791_v0 }
 0x96c   :  { %1555 = vmatprep.subr.bf16.mxu1 %v1791_v0 }
 0x96f   :  { %1556 = vmatpush3.bf16.msra.mxu1 %v1863_v14 }
 0x970   :  { %1557 = vmatprep.subr.bf16.mxu1 %v1791_v0 }
 0x973   :  { %1558 = vmatpush3.bf16.msra.mxu1 %v1871_v20 }
 0x974   :  { %1559 = vmatprep.subr.bf16.mxu1 %v1791_v0 }
 0x977   :  { %1560 = vmatpush3.bf16.msra.mxu1 %v1879_v28 }
 0x978   :  { %1561 = vmatprep.subr.bf16.mxu1 %v1791_v0 }
 0x97b   :  { %1562 = vmatpush3.bf16.msra.mxu1 %v1887_v35 }
 0x97c   :  { %1563 = vmatprep.subr.bf16.mxu1 %v1791_v0 }
 0x97f   :  { %1564 = vmatpush3.bf16.msra.mxu1 %v1895_v41 }
 0x980   :  { %1565 = vmatprep.subr.bf16.mxu1 %v1791_v0 }
 0x983   :  { %1566 = vmatpush3.bf16.msra.mxu1 %v1903_v47 }
 0x984   :  { %1567 = vmatprep.subr.bf16.mxu1 %v1791_v0 }
 0x987   :  { %1568 = vmatpush3.bf16.msra.mxu1 %v1911_v51 }
 0x988   :  { %1593 = vmatprep.subr.bf16.mxu1 %v1791_v0 }
 0xa2a   :  { %v845_v16 = vpop.f32.mrf.mxu1 }
 0xa2b   :  { %v851_v17 = vadd.f32 %v845_v16, %v645_v13 }
 0xa2c   :  { %v1531_v4 = vpop.f32.mrf.mxu1 }
 0xa2d   :  { %1645 = vtanh.f32 %v851_v17 }
 0xa2e   :  { %v848_v9 = vpop.f32.mrf.mxu1 }
 0xa30   :  { %v1532_v15 = vpop.f32.mrf.mxu1 }
 0xa3a   :  { %v1646_v21 = vpop.eup %1645 }
 0xa3b   :  { %854 = vst [vmem:[#allocation11 + $0x18] sm:$0xff] %v1646_v21  ;;  %v856_v30 = vpack.c.bf16 %v1646_v21, %v1646_v21 }
 0xa3d   :  { %1550 = vmatmul.mubr.bf16.vlgmr.msra.gmra.mxu0 %v856_v30 }
 0xa3e   :  { %1574 = vmatpush3.bf16.msra.mxu0 %v1856_v8  ;;  %1589 = vmatprep.mubr.msk.bf16.mxu0 %vm1792_vm0, %v1791_v0 }
 0xa3f   :  { %1575 = vmatprep.subr.bf16.mxu0 %v1791_v0 }
 0xa42   :  { %1576 = vmatpush3.bf16.msra.mxu0 %v1863_v14 }
 0xa43   :  { %1577 = vmatprep.subr.bf16.mxu0 %v1791_v0 }
 0xa46   :  { %1578 = vmatpush3.bf16.msra.mxu0 %v1871_v20 }
 0xa47   :  { %1579 = vmatprep.subr.bf16.mxu0 %v1791_v0 }
 0xa4a   :  { %1580 = vmatpush3.bf16.msra.mxu0 %v1879_v28 }
 0xa4b   :  { %1581 = vmatprep.subr.bf16.mxu0 %v1791_v0 }
 0xa4e   :  { %1582 = vmatpush3.bf16.msra.mxu0 %v1887_v35 }
 0xa4f   :  { %1583 = vmatprep.subr.bf16.mxu0 %v1791_v0 }
 0xa52   :  { %1584 = vmatpush3.bf16.msra.mxu0 %v1895_v41 }
 0xa53   :  { %1585 = vmatprep.subr.bf16.mxu0 %v1791_v0 }
 0xa56   :  { %1586 = vmatpush3.bf16.msra.mxu0 %v1903_v47 }
 0xa57   :  { %1587 = vmatprep.subr.bf16.mxu0 %v1791_v0 }
 0xa5a   :  { %1588 = vmatpush3.bf16.msra.mxu0 %v1911_v51 }
 0xafd   :  { %v891_v42 = vpop.f32.mrf.mxu0 }
 0xafe   :  { %v897_v48 = vadd.f32 %v891_v42, %v650_v36 }
 0xaff   :  { %v1551_v12 = vpop.f32.mrf.mxu0 }
 0xb00   :  { %1647 = vtanh.f32 %v897_v48 }
 0xb01   :  { %v894_v19 = vpop.f32.mrf.mxu0 }
 0xb03   :  { %v1552_v18 = vpop.f32.mrf.mxu0 }
 0xb0d   :  { %v1648_v23 = vpop.eup %1647 }
 0xb0e   :  { %900 = vst [vmem:[#allocation11 + $0x20] sm:$0xff] %v1648_v23  ;;  %v902_v24 = vpack.c.bf16 %v1648_v23, %v1648_v23 }
 0xb10   :  { %1570 = vmatmul.mubr.bf16.vlgmr.msra.gmra.mxu1 %v902_v24 }
 0xb11   :  { %1594 = vmatpush3.bf16.msra.mxu1 %v1856_v8  ;;  %1609 = vmatprep.mubr.msk.bf16.mxu1 %vm1792_vm0, %v1791_v0  ;;  %v653_v8 = vadd.f32 %v1958_v2, %v2187_v54 }
 0xb12   :  { %1595 = vmatprep.subr.bf16.mxu1 %v1791_v0 }
 0xb15   :  { %1596 = vmatpush3.bf16.msra.mxu1 %v1863_v14 }
 0xb16   :  { %1597 = vmatprep.subr.bf16.mxu1 %v1791_v0 }
 0xb19   :  { %1598 = vmatpush3.bf16.msra.mxu1 %v1871_v20 }
 0xb1a   :  { %1599 = vmatprep.subr.bf16.mxu1 %v1791_v0 }
 0xb1d   :  { %1600 = vmatpush3.bf16.msra.mxu1 %v1879_v28 }
 0xb1e   :  { %1601 = vmatprep.subr.bf16.mxu1 %v1791_v0 }
 0xb21   :  { %1602 = vmatpush3.bf16.msra.mxu1 %v1887_v35 }
 0xb22   :  { %1603 = vmatprep.subr.bf16.mxu1 %v1791_v0 }
 0xb25   :  { %1604 = vmatpush3.bf16.msra.mxu1 %v1895_v41 }
 0xb26   :  { %1605 = vmatprep.subr.bf16.mxu1 %v1791_v0 }
 0xb29   :  { %1606 = vmatpush3.bf16.msra.mxu1 %v1903_v47  ;;  %v658_v47 = vadd.f32 %v2181_v50, %v1958_v2 }
 0xb2a   :  { %1607 = vmatprep.subr.bf16.mxu1 %v1791_v0 }
 0xb2d   :  { %1608 = vmatpush3.bf16.msra.mxu1 %v1911_v51 }
 0xbd0   :  { %v937_v14 = vpop.f32.mrf.mxu1 }
 0xbd1   :  { %v943_v20 = vadd.f32 %v937_v14, %v653_v8 }
 0xbd2   :  { %v1571_v28 = vpop.f32.mrf.mxu1 }
 0xbd3   :  { %1649 = vtanh.f32 %v943_v20 }
 0xbd4   :  { %v940_v35 = vpop.f32.mrf.mxu1 }
 0xbd6   :  { %v1572_v25 = vpop.f32.mrf.mxu1 }
 0xbe0   :  { %v1650_v26 = vpop.eup %1649 }
 0xbe1   :  { %946 = vst [vmem:[#allocation11 + $0x28] sm:$0xff] %v1650_v26  ;;  %v948_v41 = vpack.c.bf16 %v1650_v26, %v1650_v26 }
 0xbe3   :  { %1590 = vmatmul.mubr.bf16.vlgmr.msra.gmra.mxu0 %v948_v41 }
 0xca3   :  { %v983_v27 = vpop.f32.mrf.mxu0 }
 0xca4   :  { %v989_v0 = vadd.f32 %v983_v27, %v658_v47 }
 0xca5   :  { %v1591_v29 = vpop.f32.mrf.mxu0 }
 0xca6   :  { %1651 = vtanh.f32 %v989_v0 }
 0xca7   :  { %v986_v51 = vpop.f32.mrf.mxu0 }
 0xca9   :  { %v1592_v31 = vpop.f32.mrf.mxu0 }
 0xcb3   :  { %v1652_v32 = vpop.eup %1651 }
 0xcb4   :  { %992 = vst [vmem:[#allocation11 + $0x30] sm:$0xff] %v1652_v32  ;;  %v994_v22 = vpack.c.bf16 %v1652_v32, %v1652_v32 }
 0xcb6   :  { %1610 = vmatmul.mubr.bf16.vlgmr.msra.gmra.mxu1 %v994_v22 }
 0xd76   :  { %v1029_v34 = vpop.f32.mrf.mxu1 }
 0xd77   :  { %v1035_v37 = vadd.f32 %v1029_v34, %v661_v33 }
 0xd78   :  { %v1611_v38 = vpop.f32.mrf.mxu1 }
 0xd79   :  { %1653 = vtanh.f32 %v1035_v37 }
 0xd7a   :  { %v1032_v39 = vpop.f32.mrf.mxu1 }
 0xd7c   :  { %v1612_v40 = vpop.f32.mrf.mxu1 }
 0xd86   :  { %v1654_v43 = vpop.eup %1653 }
 0xd87   :  { %1038 = vst [vmem:[#allocation11 + $0x38] sm:$0xff] %v1654_v43  ;;  %1040 = vst [vmem:[#allocation12 + $0x8] sm:$0xff] %v1654_v43 }
 0xd88   :  { %1746 = shalt.err (!%p1743_p10)
}
 0xd89   :  { %1052 = dma.vmem_to_hbm [thread:$0]  %s1047_s17, 1024, %s2288_s5, [#allocation5], %s1787_s29, %s1787_s29, %s1788_s30  }
 0xd8a   :  { %s1755_s23 = scalar_lea.vmem %s1059_s19, 256  ;;  %p1760_p12 = scmp.lt.s32.totalorder %s1059_s19, %s1059_s19 }
 0xd8b   :  { %p1756_p11 = scmp.ne.s32.totalorder %s1059_s19, %s1755_s23  ;;  %p1761_p13 = scmp.lt.s32.totalorder %s1755_s23, %s1755_s23 }
 0xd8d   :  { %p1762_p0 = por %p1761_p13, %p1760_p12 }
 0xd8f   :  { %p1763_p1 = pnand %p1762_p0, %p1756_p11 }
 0xd91   :  { %1766 = shalt.err (!%p1763_p1)
}
 0xd92   :  { %1064 = dma.vmem_to_hbm [thread:$0]  %s1059_s19, 256, %s2289_s6, [#allocation13], %s1787_s29, %s1787_s29, %s1788_s30  }
 0xd93   :  { %1781 = dma.done.wait [#allocation5], 1024  }
 0xd94   :  { %1782 = vsyncadd [#allocation5], 4294966272 }
 0xd95   :  { %1783 = dma.done.wait [#allocation13], 256  }
 0xd96   :  { %1784 = vsyncadd [#allocation13], 4294967040 }
 0xd97   :  { %1071 = vsyncpa [#allocation4], 1 }
 0xd98   :  { %1072 = vsyncpa [#allocation7], 1 }
 0xd99   :  { %1073 = vsyncpa [#allocation10], 1 }
 0xd9a   :  { %1074 = vsyncpa [#allocation5], 1 }
 0xd9b   :  { %1075 = vsyncpa [#allocation13], 1 }

</bundles_post_ra>
